<compile_context>
chip_gen: v7x
topology: tpu7x:2x2x1
jax: 0.10.0
libtpu: 0.0.40
codegen_flags: <defaults>
</compile_context>

<pallas_src>
import jax
import jax.numpy as jnp
import numpy as np
from jax.experimental import pallas as pl
from jax.experimental.pallas import tpu as pltpu

VMEM_SPEC = pl.BlockSpec(memory_space=pltpu.MemorySpace.VMEM)


# ------------------------------ Fused Pallas kernel ------------------------------ #

def _task_model_kernel(te_ref, w1_ref, b1_ref, w2_ref, b2_ref,
                       wslab_ref, bslab_ref, x_ref, clf_wt_ref, clf_b_ref,
                       out_ref):
    # --- 1) mixer MLP: uploaded = relu(te @ w1 + b1) @ w2 + b2 ------------------- #
    h = jnp.dot(te_ref[...], w1_ref[...],
                preferred_element_type=jnp.float32) + b1_ref[...]
    h = jnp.maximum(h, 0.0)
    uploaded = jnp.dot(h, w2_ref[...],
                       preferred_element_type=jnp.float32) + b2_ref[...]

    T = te_ref.shape[0]
    n_models, F, D = wslab_ref.shape

    # uploaded_weights[-1] via static T-1 mask + sublane reduce (keeps everything in
    # plain reduce/broadcast patterns, no awkward sub-vreg slices).
    rows = jax.lax.broadcasted_iota(jnp.int32, uploaded.shape, 0)
    w_last = jnp.sum(jnp.where(rows == T - 1, uploaded, 0.0),
                     axis=0, keepdims=True)                          # (1, n_models)
    cols = jax.lax.broadcasted_iota(jnp.int32, w_last.shape, 1)

    # --- 2) model_param = sum_i w_i * params_i  (VPU FMAs, f32 accumulate) ------- #
    w_mix = jnp.zeros((F, D), jnp.float32)
    b_mix = jnp.zeros((1, F), jnp.float32)
    for i in range(n_models):                                        # static unroll (6)
        wi = jnp.sum(jnp.where(cols == i, w_last, 0.0),
                     axis=1, keepdims=True)                          # (1, 1)
        wi_row = jnp.broadcast_to(wi, (1, D))                        # lane broadcast
        w_mix = w_mix + wi_row * wslab_ref[i]                        # (F, D) lane-dense
        b_mix = b_mix + wi * bslab_ref[i:i + 1, :]                   # (1, F)

    # --- 3) forward_with_param: relu(x @ W^T + b)  (contract last dims, no .T) --- #
    feat = jax.lax.dot_general(x_ref[...], w_mix,
                               dimension_numbers=(((1,), (1,)), ((), ())),
                               preferred_element_type=jnp.float32) + b_mix
    feat = jnp.maximum(feat, 0.0)

    # --- 4) classifier (weights pre-transposed, lane-padded to 128) -------------- #
    out_ref[...] = jnp.dot(feat, clf_wt_ref[...],
                           preferred_element_type=jnp.float32) + clf_b_ref[...]


# ----------------------------------- Wrapper ------------------------------------- #

def task_model_forward(x_img, p):
    B = x_img.shape[0]
    x = x_img.reshape(B, -1)                           # NCHW -> (N, C*H*W)

    T, E = p["text_embedding"].shape
    H = p["mix_w1"].shape[1]
    n_models, F, D = p["w_slab"].shape
    Cp = p["clf_wt"].shape[1]

    flops = 2 * (T * E * H + T * H * n_models + n_models * F * D
                 + B * D * F + B * F * Cp)
    bytes_accessed = 4 * (T * E + E * H + H + H * n_models + n_models
                          + n_models * F * D + n_models * F
                          + B * D + F * Cp + Cp + B * Cp)

    out_padded = pl.pallas_call(
        _task_model_kernel,
        out_shape=jax.ShapeDtypeStruct((B, Cp), jnp.float32),
        in_specs=[VMEM_SPEC] * 10,
        out_specs=VMEM_SPEC,
        cost_estimate=pl.CostEstimate(flops=flops, transcendentals=0,
                                      bytes_accessed=bytes_accessed),
    )(p["text_embedding"], p["mix_w1"], p["mix_b1"], p["mix_w2"], p["mix_b2"],
      p["w_slab"], p["b_slab"], x, p["clf_wt"], p["clf_b_pad"])

    return out_padded[:, :p["n_cls"]]                  # drop lane padding once


def task_model_reference(x_img, p):
    # pure-JAX reference for correctness checking
    h = jnp.maximum(p["text_embedding"] @ p["mix_w1"] + p["mix_b1"], 0.0)
    uploaded = h @ p["mix_w2"] + p["mix_b2"]
    w = uploaded[-1]                                   # (n_models,)
    W = jnp.einsum("i,ifd->fd", w, p["w_slab"])        # (feat, in_dim)
    b = w @ p["b_slab"]                                # (feat,)
    x = x_img.reshape(x_img.shape[0], -1)
    feat = jnp.maximum(x @ W.T + b, 0.0)
    return feat @ p["clf_w"].T + p["clf_b"]


# ------------------------------ Deterministic init -------------------------------- #

def init_params(key, *, T=4, E=32, H=32, n_models=6, in_dim=4 * 16 * 16,
                feat=64, n_cls=10, lane=128):
    ks = jax.random.split(key, 6)
    scale = 0.05
    text_embedding = jax.random.normal(ks[0], (T, E), jnp.float32)
    mix_w1 = scale * jax.random.normal(ks[1], (E, H), jnp.float32)
    mix_b1 = jnp.zeros((1, H), jnp.float32)
    mix_w2 = scale * jax.random.normal(ks[2], (H, n_models), jnp.float32)
    mix_b2 = jnp.zeros((1, n_models), jnp.float32)

    # 6 base models, each a Linear(in_dim -> feat).  Stored as lane-dense slabs:
    #   w_slab: (n_models, feat, in_dim)   last dim 1024 = 8*128, no lane padding
    #   b_slab: (n_models, feat)
    w_slab = scale * jax.random.normal(ks[3], (n_models, feat, in_dim), jnp.float32)
    b_slab = scale * jax.random.normal(ks[4], (n_models, feat), jnp.float32)

    clf_w = scale * jax.random.normal(ks[5], (n_cls, feat), jnp.float32)
    clf_b = jnp.zeros((n_cls,), jnp.float32)

    # Pre-transposed, lane-padded classifier params for the fused kernel
    n_cls_pad = ((n_cls + lane - 1) // lane) * lane
    clf_wt = jnp.zeros((feat, n_cls_pad), jnp.float32).at[:, :n_cls].set(clf_w.T)
    clf_b_pad = jnp.zeros((1, n_cls_pad), jnp.float32).at[:, :n_cls].set(clf_b)

    return dict(text_embedding=text_embedding,
                mix_w1=mix_w1, mix_b1=mix_b1, mix_w2=mix_w2, mix_b2=mix_b2,
                w_slab=w_slab, b_slab=b_slab,
                clf_w=clf_w, clf_b=clf_b,
                clf_wt=clf_wt, clf_b_pad=clf_b_pad,
                n_cls=n_cls)


if __name__ == "__main__":
    key = jax.random.PRNGKey(0)
    k_param, k_x = jax.random.split(key)
    params = init_params(k_param)

    x = jax.random.normal(k_x, (2, 4, 16, 16), jnp.float32)   # NCHW

    out = jax.block_until_ready(task_model_forward(x, params))
    ref = jax.block_until_ready(task_model_reference(x, params))

    np.testing.assert_allclose(np.asarray(out), np.asarray(ref),
                               rtol=1e-4, atol=1e-4)
    assert out.shape == (2, 10)
    print("KERNEL_OK")
</pallas_src>

<mosaic_0001>
module attributes {stable_mosaic.version = 11 : i64} {
  func.func @_task_model_kernel(%arg0: memref<4x32xf32, #tpu.memory_space<vmem>>, %arg1: memref<32x32xf32, #tpu.memory_space<vmem>>, %arg2: memref<1x32xf32, #tpu.memory_space<vmem>>, %arg3: memref<32x6xf32, #tpu.memory_space<vmem>>, %arg4: memref<1x6xf32, #tpu.memory_space<vmem>>, %arg5: memref<6x64x1024xf32, #tpu.memory_space<vmem>>, %arg6: memref<6x64xf32, #tpu.memory_space<vmem>>, %arg7: memref<2x1024xf32, #tpu.memory_space<vmem>>, %arg8: memref<64x128xf32, #tpu.memory_space<vmem>>, %arg9: memref<1x128xf32, #tpu.memory_space<vmem>>, %arg10: memref<2x128xf32, #tpu.memory_space<vmem>>) attributes {dimension_semantics = [], scalar_prefetch = 0 : i64, scratch_operands = 0 : i64, tpu.core_type = #tpu.core_type<tc>} {
    %c0 = arith.constant 0 : index
    %c0_0 = arith.constant 0 : index
    %0 = vector.load %arg0[%c0, %c0_0] : memref<4x32xf32, #tpu.memory_space<vmem>>, vector<4x32xf32>
    %c0_1 = arith.constant 0 : index
    %c0_2 = arith.constant 0 : index
    %1 = vector.load %arg1[%c0_1, %c0_2] : memref<32x32xf32, #tpu.memory_space<vmem>>, vector<32x32xf32>
    %cst = arith.constant dense<0.000000e+00> : vector<4x32xf32>
    %2 = tpu.matmul %0, %1, %cst {dimension_numbers = #tpu.dot_dimension_numbers<[1], [0], [0], [1], [0, 0, 1, 1], [], []>} : vector<4x32xf32>, vector<32x32xf32>, vector<4x32xf32> -> vector<4x32xf32>
    %c0_3 = arith.constant 0 : index
    %c0_4 = arith.constant 0 : index
    %3 = vector.load %arg2[%c0_3, %c0_4] : memref<1x32xf32, #tpu.memory_space<vmem>>, vector<1x32xf32>
    %4 = vector.broadcast %3 : vector<1x32xf32> to vector<4x32xf32>
    %5 = arith.addf %2, %4 : vector<4x32xf32>
    %cst_5 = arith.constant 0.000000e+00 : f32
    %6 = vector.broadcast %cst_5 : f32 to vector<4x32xf32>
    %7 = arith.maximumf %5, %6 : vector<4x32xf32>
    %c0_6 = arith.constant 0 : index
    %c0_7 = arith.constant 0 : index
    %8 = vector.load %arg3[%c0_6, %c0_7] : memref<32x6xf32, #tpu.memory_space<vmem>>, vector<32x6xf32>
    %cst_8 = arith.constant dense<0.000000e+00> : vector<4x6xf32>
    %9 = tpu.matmul %7, %8, %cst_8 {dimension_numbers = #tpu.dot_dimension_numbers<[1], [0], [0], [1], [0, 0, 1, 1], [], []>} : vector<4x32xf32>, vector<32x6xf32>, vector<4x6xf32> -> vector<4x6xf32>
    %c0_9 = arith.constant 0 : index
    %c0_10 = arith.constant 0 : index
    %10 = vector.load %arg4[%c0_9, %c0_10] : memref<1x6xf32, #tpu.memory_space<vmem>>, vector<1x6xf32>
    %11 = vector.broadcast %10 : vector<1x6xf32> to vector<4x6xf32>
    %12 = arith.addf %9, %11 : vector<4x6xf32>
    %13 = tpu.iota {dimensions = array<i32: 0>} : vector<4x6xi32>
    %c3_i32 = arith.constant 3 : i32
    %14 = vector.broadcast %c3_i32 : i32 to vector<4x6xi32>
    %15 = arith.cmpi eq, %13, %14 : vector<4x6xi32>
    %cst_11 = arith.constant 0.000000e+00 : f32
    %16 = vector.broadcast %cst_11 : f32 to vector<4x6xf32>
    %17 = arith.select %15, %12, %16 : vector<4x6xi1>, vector<4x6xf32>
    %cst_12 = arith.constant dense<0.000000e+00> : vector<6xf32>
    %18 = vector.multi_reduction <add>, %17, %cst_12 [0] : vector<4x6xf32> to vector<6xf32>
    %19 = vector.shape_cast %18 : vector<6xf32> to vector<1x6xf32>
    %20 = tpu.iota {dimensions = array<i32: 1>} : vector<1x6xi32>
    %cst_13 = arith.constant 0.000000e+00 : f32
    %21 = vector.broadcast %cst_13 : f32 to vector<64x1024xf32>
    %cst_14 = arith.constant 0.000000e+00 : f32
    %22 = vector.broadcast %cst_14 : f32 to vector<1x64xf32>
    %c0_i32 = arith.constant 0 : i32
    %23 = vector.broadcast %c0_i32 : i32 to vector<1x6xi32>
    %24 = arith.cmpi eq, %20, %23 : vector<1x6xi32>
    %cst_15 = arith.constant 0.000000e+00 : f32
    %25 = vector.broadcast %cst_15 : f32 to vector<1x6xf32>
    %26 = arith.select %24, %19, %25 : vector<1x6xi1>, vector<1x6xf32>
    %cst_16 = arith.constant dense<0.000000e+00> : vector<1xf32>
    %27 = vector.multi_reduction <add>, %26, %cst_16 [1] : vector<1x6xf32> to vector<1xf32>
    %28 = vector.shape_cast %27 : vector<1xf32> to vector<1x1xf32>
    %29 = vector.shape_cast %28 : vector<1x1xf32> to vector<1x1xf32>
    %30 = vector.broadcast %29 : vector<1x1xf32> to vector<1x1024xf32>
    %c0_17 = arith.constant 0 : index
    %c0_18 = arith.constant 0 : index
    %c0_19 = arith.constant 0 : index
    %31 = vector.load %arg5[%c0_17, %c0_18, %c0_19] : memref<6x64x1024xf32, #tpu.memory_space<vmem>>, vector<1x64x1024xf32>
    %32 = vector.shape_cast %31 : vector<1x64x1024xf32> to vector<64x1024xf32>
    %33 = vector.broadcast %30 : vector<1x1024xf32> to vector<64x1024xf32>
    %34 = arith.mulf %33, %32 : vector<64x1024xf32>
    %35 = arith.addf %21, %34 : vector<64x1024xf32>
    %c0_20 = arith.constant 0 : index
    %c0_21 = arith.constant 0 : index
    %36 = vector.load %arg6[%c0_20, %c0_21] : memref<6x64xf32, #tpu.memory_space<vmem>>, vector<1x64xf32>
    %37 = vector.broadcast %28 : vector<1x1xf32> to vector<1x64xf32>
    %38 = arith.mulf %37, %36 : vector<1x64xf32>
    %39 = arith.addf %22, %38 : vector<1x64xf32>
    %c1_i32 = arith.constant 1 : i32
    %40 = vector.broadcast %c1_i32 : i32 to vector<1x6xi32>
    %41 = arith.cmpi eq, %20, %40 : vector<1x6xi32>
    %cst_22 = arith.constant 0.000000e+00 : f32
    %42 = vector.broadcast %cst_22 : f32 to vector<1x6xf32>
    %43 = arith.select %41, %19, %42 : vector<1x6xi1>, vector<1x6xf32>
    %cst_23 = arith.constant dense<0.000000e+00> : vector<1xf32>
    %44 = vector.multi_reduction <add>, %43, %cst_23 [1] : vector<1x6xf32> to vector<1xf32>
    %45 = vector.shape_cast %44 : vector<1xf32> to vector<1x1xf32>
    %46 = vector.shape_cast %45 : vector<1x1xf32> to vector<1x1xf32>
    %47 = vector.broadcast %46 : vector<1x1xf32> to vector<1x1024xf32>
    %c1 = arith.constant 1 : index
    %c0_24 = arith.constant 0 : index
    %c0_25 = arith.constant 0 : index
    %48 = vector.load %arg5[%c1, %c0_24, %c0_25] : memref<6x64x1024xf32, #tpu.memory_space<vmem>>, vector<1x64x1024xf32>
    %49 = vector.shape_cast %48 : vector<1x64x1024xf32> to vector<64x1024xf32>
    %50 = vector.broadcast %47 : vector<1x1024xf32> to vector<64x1024xf32>
    %51 = arith.mulf %50, %49 : vector<64x1024xf32>
    %52 = arith.addf %35, %51 : vector<64x1024xf32>
    %c1_26 = arith.constant 1 : index
    %c0_27 = arith.constant 0 : index
    %53 = vector.load %arg6[%c1_26, %c0_27] : memref<6x64xf32, #tpu.memory_space<vmem>>, vector<1x64xf32>
    %54 = vector.broadcast %45 : vector<1x1xf32> to vector<1x64xf32>
    %55 = arith.mulf %54, %53 : vector<1x64xf32>
    %56 = arith.addf %39, %55 : vector<1x64xf32>
    %c2_i32 = arith.constant 2 : i32
    %57 = vector.broadcast %c2_i32 : i32 to vector<1x6xi32>
    %58 = arith.cmpi eq, %20, %57 : vector<1x6xi32>
    %cst_28 = arith.constant 0.000000e+00 : f32
    %59 = vector.broadcast %cst_28 : f32 to vector<1x6xf32>
    %60 = arith.select %58, %19, %59 : vector<1x6xi1>, vector<1x6xf32>
    %cst_29 = arith.constant dense<0.000000e+00> : vector<1xf32>
    %61 = vector.multi_reduction <add>, %60, %cst_29 [1] : vector<1x6xf32> to vector<1xf32>
    %62 = vector.shape_cast %61 : vector<1xf32> to vector<1x1xf32>
    %63 = vector.shape_cast %62 : vector<1x1xf32> to vector<1x1xf32>
    %64 = vector.broadcast %63 : vector<1x1xf32> to vector<1x1024xf32>
    %c2 = arith.constant 2 : index
    %c0_30 = arith.constant 0 : index
    %c0_31 = arith.constant 0 : index
    %65 = vector.load %arg5[%c2, %c0_30, %c0_31] : memref<6x64x1024xf32, #tpu.memory_space<vmem>>, vector<1x64x1024xf32>
    %66 = vector.shape_cast %65 : vector<1x64x1024xf32> to vector<64x1024xf32>
    %67 = vector.broadcast %64 : vector<1x1024xf32> to vector<64x1024xf32>
    %68 = arith.mulf %67, %66 : vector<64x1024xf32>
    %69 = arith.addf %52, %68 : vector<64x1024xf32>
    %c2_32 = arith.constant 2 : index
    %c0_33 = arith.constant 0 : index
    %70 = vector.load %arg6[%c2_32, %c0_33] : memref<6x64xf32, #tpu.memory_space<vmem>>, vector<1x64xf32>
    %71 = vector.broadcast %62 : vector<1x1xf32> to vector<1x64xf32>
    %72 = arith.mulf %71, %70 : vector<1x64xf32>
    %73 = arith.addf %56, %72 : vector<1x64xf32>
    %c3_i32_34 = arith.constant 3 : i32
    %74 = vector.broadcast %c3_i32_34 : i32 to vector<1x6xi32>
    %75 = arith.cmpi eq, %20, %74 : vector<1x6xi32>
    %cst_35 = arith.constant 0.000000e+00 : f32
    %76 = vector.broadcast %cst_35 : f32 to vector<1x6xf32>
    %77 = arith.select %75, %19, %76 : vector<1x6xi1>, vector<1x6xf32>
    %cst_36 = arith.constant dense<0.000000e+00> : vector<1xf32>
    %78 = vector.multi_reduction <add>, %77, %cst_36 [1] : vector<1x6xf32> to vector<1xf32>
    %79 = vector.shape_cast %78 : vector<1xf32> to vector<1x1xf32>
    %80 = vector.shape_cast %79 : vector<1x1xf32> to vector<1x1xf32>
    %81 = vector.broadcast %80 : vector<1x1xf32> to vector<1x1024xf32>
    %c3 = arith.constant 3 : index
    %c0_37 = arith.constant 0 : index
    %c0_38 = arith.constant 0 : index
    %82 = vector.load %arg5[%c3, %c0_37, %c0_38] : memref<6x64x1024xf32, #tpu.memory_space<vmem>>, vector<1x64x1024xf32>
    %83 = vector.shape_cast %82 : vector<1x64x1024xf32> to vector<64x1024xf32>
    %84 = vector.broadcast %81 : vector<1x1024xf32> to vector<64x1024xf32>
    %85 = arith.mulf %84, %83 : vector<64x1024xf32>
    %86 = arith.addf %69, %85 : vector<64x1024xf32>
    %c3_39 = arith.constant 3 : index
    %c0_40 = arith.constant 0 : index
    %87 = vector.load %arg6[%c3_39, %c0_40] : memref<6x64xf32, #tpu.memory_space<vmem>>, vector<1x64xf32>
    %88 = vector.broadcast %79 : vector<1x1xf32> to vector<1x64xf32>
    %89 = arith.mulf %88, %87 : vector<1x64xf32>
    %90 = arith.addf %73, %89 : vector<1x64xf32>
    %c4_i32 = arith.constant 4 : i32
    %91 = vector.broadcast %c4_i32 : i32 to vector<1x6xi32>
    %92 = arith.cmpi eq, %20, %91 : vector<1x6xi32>
    %cst_41 = arith.constant 0.000000e+00 : f32
    %93 = vector.broadcast %cst_41 : f32 to vector<1x6xf32>
    %94 = arith.select %92, %19, %93 : vector<1x6xi1>, vector<1x6xf32>
    %cst_42 = arith.constant dense<0.000000e+00> : vector<1xf32>
    %95 = vector.multi_reduction <add>, %94, %cst_42 [1] : vector<1x6xf32> to vector<1xf32>
    %96 = vector.shape_cast %95 : vector<1xf32> to vector<1x1xf32>
    %97 = vector.shape_cast %96 : vector<1x1xf32> to vector<1x1xf32>
    %98 = vector.broadcast %97 : vector<1x1xf32> to vector<1x1024xf32>
    %c4 = arith.constant 4 : index
    %c0_43 = arith.constant 0 : index
    %c0_44 = arith.constant 0 : index
    %99 = vector.load %arg5[%c4, %c0_43, %c0_44] : memref<6x64x1024xf32, #tpu.memory_space<vmem>>, vector<1x64x1024xf32>
    %100 = vector.shape_cast %99 : vector<1x64x1024xf32> to vector<64x1024xf32>
    %101 = vector.broadcast %98 : vector<1x1024xf32> to vector<64x1024xf32>
    %102 = arith.mulf %101, %100 : vector<64x1024xf32>
    %103 = arith.addf %86, %102 : vector<64x1024xf32>
    %c4_45 = arith.constant 4 : index
    %c0_46 = arith.constant 0 : index
    %104 = vector.load %arg6[%c4_45, %c0_46] : memref<6x64xf32, #tpu.memory_space<vmem>>, vector<1x64xf32>
    %105 = vector.broadcast %96 : vector<1x1xf32> to vector<1x64xf32>
    %106 = arith.mulf %105, %104 : vector<1x64xf32>
    %107 = arith.addf %90, %106 : vector<1x64xf32>
    %c5_i32 = arith.constant 5 : i32
    %108 = vector.broadcast %c5_i32 : i32 to vector<1x6xi32>
    %109 = arith.cmpi eq, %20, %108 : vector<1x6xi32>
    %cst_47 = arith.constant 0.000000e+00 : f32
    %110 = vector.broadcast %cst_47 : f32 to vector<1x6xf32>
    %111 = arith.select %109, %19, %110 : vector<1x6xi1>, vector<1x6xf32>
    %cst_48 = arith.constant dense<0.000000e+00> : vector<1xf32>
    %112 = vector.multi_reduction <add>, %111, %cst_48 [1] : vector<1x6xf32> to vector<1xf32>
    %113 = vector.shape_cast %112 : vector<1xf32> to vector<1x1xf32>
    %114 = vector.shape_cast %113 : vector<1x1xf32> to vector<1x1xf32>
    %115 = vector.broadcast %114 : vector<1x1xf32> to vector<1x1024xf32>
    %c5 = arith.constant 5 : index
    %c0_49 = arith.constant 0 : index
    %c0_50 = arith.constant 0 : index
    %116 = vector.load %arg5[%c5, %c0_49, %c0_50] : memref<6x64x1024xf32, #tpu.memory_space<vmem>>, vector<1x64x1024xf32>
    %117 = vector.shape_cast %116 : vector<1x64x1024xf32> to vector<64x1024xf32>
    %118 = vector.broadcast %115 : vector<1x1024xf32> to vector<64x1024xf32>
    %119 = arith.mulf %118, %117 : vector<64x1024xf32>
    %120 = arith.addf %103, %119 : vector<64x1024xf32>
    %c5_51 = arith.constant 5 : index
    %c0_52 = arith.constant 0 : index
    %121 = vector.load %arg6[%c5_51, %c0_52] : memref<6x64xf32, #tpu.memory_space<vmem>>, vector<1x64xf32>
    %122 = vector.broadcast %113 : vector<1x1xf32> to vector<1x64xf32>
    %123 = arith.mulf %122, %121 : vector<1x64xf32>
    %124 = arith.addf %107, %123 : vector<1x64xf32>
    %c0_53 = arith.constant 0 : index
    %c0_54 = arith.constant 0 : index
    %125 = vector.load %arg7[%c0_53, %c0_54] : memref<2x1024xf32, #tpu.memory_space<vmem>>, vector<2x1024xf32>
    %cst_55 = arith.constant dense<0.000000e+00> : vector<2x64xf32>
    %126 = tpu.matmul %125, %120, %cst_55 {dimension_numbers = #tpu.dot_dimension_numbers<[1], [1], [0], [0], [0, 0, 1, 0], [], []>} : vector<2x1024xf32>, vector<64x1024xf32>, vector<2x64xf32> -> vector<2x64xf32>
    %127 = vector.broadcast %124 : vector<1x64xf32> to vector<2x64xf32>
    %128 = arith.addf %126, %127 : vector<2x64xf32>
    %cst_56 = arith.constant 0.000000e+00 : f32
    %129 = vector.broadcast %cst_56 : f32 to vector<2x64xf32>
    %130 = arith.maximumf %128, %129 : vector<2x64xf32>
    %c0_57 = arith.constant 0 : index
    %c0_58 = arith.constant 0 : index
    %131 = vector.load %arg8[%c0_57, %c0_58] : memref<64x128xf32, #tpu.memory_space<vmem>>, vector<64x128xf32>
    %cst_59 = arith.constant dense<0.000000e+00> : vector<2x128xf32>
    %132 = tpu.matmul %130, %131, %cst_59 {dimension_numbers = #tpu.dot_dimension_numbers<[1], [0], [0], [1], [0, 0, 1, 1], [], []>} : vector<2x64xf32>, vector<64x128xf32>, vector<2x128xf32> -> vector<2x128xf32>
    %c0_60 = arith.constant 0 : index
    %c0_61 = arith.constant 0 : index
    %133 = vector.load %arg9[%c0_60, %c0_61] : memref<1x128xf32, #tpu.memory_space<vmem>>, vector<1x128xf32>
    %134 = vector.broadcast %133 : vector<1x128xf32> to vector<2x128xf32>
    %135 = arith.addf %132, %134 : vector<2x128xf32>
    %c0_62 = arith.constant 0 : index
    %c0_63 = arith.constant 0 : index
    %136 = vector.load %arg10[%c0_62, %c0_63] : memref<2x128xf32, #tpu.memory_space<vmem>>, vector<2x128xf32>
    tpu.vector_store %arg10[%c0_62, %c0_63], %135 {strides = array<i32>} : memref<2x128xf32, #tpu.memory_space<vmem>>, vector<2x128xf32>,
    return
  }
}

</mosaic_0001>

<bundles_post_ra>
// kernel: tpu_custom_call.1
= control target key start
LH: loop header
LB: loop body
LE: loop exit
PB: predicated region body
PF: predicated region fallthrough
CT: control target
= control target key end

     0   :  { %15 = vsyncpa [#allocation3], 0  ;;  %s3065_s0 = inlined_call_operand.hbm [shape: f32[4,32], index: 0, kind: input, shape index: {}]   ;;  %s3066_s1 = inlined_call_operand.hbm [shape: f32[32,32], index: 1, kind: input, shape index: {}]   ;;  %s3067_s2 = inlined_call_operand.hbm [shape: f32[1,32], index: 2, kind: input, shape index: {}]   ;;  %s3068_s3 = inlined_call_operand.vmem [shape: f32[32,6], index: 3, kind: input, shape index: {}]   ;;  %s3069_s4 = inlined_call_operand.hbm [shape: f32[1,6], index: 4, kind: input, shape index: {}]   ;;  %s3070_s5 = inlined_call_operand.hbm [shape: f32[6,64,1024], index: 5, kind: input, shape index: {}]   ;;  %s3071_s6 = inlined_call_operand.hbm [shape: f32[6,64], index: 6, kind: input, shape index: {}]   ;;  %s3072_s7 = inlined_call_operand.hbm [shape: f32[2,1024], index: 7, kind: input, shape index: {}]   ;;  %s3073_s8 = inlined_call_operand.hbm [shape: f32[64,128], index: 8, kind: input, shape index: {}]   ;;  %s3074_s9 = inlined_call_operand.hbm [shape: f32[1,128], index: 9, kind: input, shape index: {}]   ;;  %s3075_s10 = inlined_call_operand.hbm [shape: f32[2,128], index: 10, kind: output, shape index: {}]  }
   0x1   :  { %16 = vsyncpa [#allocation6], 0 }
   0x2   :  { %17 = vsyncpa [#allocation9], 0 }
   0x3   :  { %18 = vsyncpa [#allocation12], 0 }
   0x4   :  { %19 = vsyncpa [#allocation15], 0 }
   0x5   :  { %20 = vsyncpa [#allocation4], 0  ;;  %s2393_s13 = smov [#allocation5]   ;;  %s2161_s17 = scalar_lea.hbm %s3066_s1, 512 }
   0x6   :  { %s36_s14 = sshll.u32 %s2393_s13, 4  ;;  %p2162_p0 = scmp.ne.s32.totalorder %s3066_s1, %s2161_s17  ;;  %s37_s14 = int_to_ptr.vmem [resolvable:$true] %s36_s14 }
   0x7   :  { %p2165_p1 = scmp.lt.u32.totalorder %s2161_s17, %s3066_s1 }
   0x9   :  { %p2167_p2 = pnand %p2165_p1, %p2162_p0 }
   0xb   :  { %2170 = shalt.err (!%p2167_p2)
}
   0xc   :  { %s2171_s22 = scalar_lea.vmem %s37_s14, 512  ;;  %p2176_p4 = scmp.lt.s32.totalorder %s37_s14, %s37_s14 }
   0xd   :  { %p2172_p3 = scmp.ne.s32.totalorder %s37_s14, %s2171_s22  ;;  %p2177_p5 = scmp.lt.s32.totalorder %s2171_s22, %s2171_s22 }
   0xf   :  { %p2178_p6 = por %p2177_p5, %p2176_p4 }
  0x11   :  { %p2179_p7 = pnand %p2178_p6, %p2172_p3 }
  0x13   :  { %2182 = shalt.err (!%p2179_p7)
}
  0x14   :  { %s2394_s23 = smov 128   ;;  %s2395_s24 = smov 8  }
  0x15   :  { %42 = dma.hbm_to_vmem [thread:$0]  %s3066_s1, 512, %s37_s14, [#allocation6], %s2394_s23, %s2394_s23, %s2395_s24  }
  0x16   :  { %s2396_s27 = smov [#allocation8]   ;;  %s2397_s29 = smov [#allocation11]  }
  0x17   :  { %s61_s28 = sshll.u32 %s2396_s27, 4  ;;  %s83_s30 = sshll.u32 %s2397_s29, 4  ;;  %s62_s28 = int_to_ptr.vmem [resolvable:$true] %s61_s28  ;;  %s84_s30 = int_to_ptr.vmem [resolvable:$true] %s83_s30 }
  0x18   :  { %s2183_s13 = scalar_lea.hbm %s3069_s4, 16 }
  0x19   :  { %p2184_p8 = scmp.ne.s32.totalorder %s3069_s4, %s2183_s13  ;;  %p2187_p9 = scmp.lt.u32.totalorder %s2183_s13, %s3069_s4 }
  0x1b   :  { %p2189_p10 = pnand %p2187_p9, %p2184_p8 }
  0x1d   :  { %2192 = shalt.err (!%p2189_p10)
}
  0x1e   :  { %s2193_s1 = scalar_lea.vmem %s62_s28, 16  ;;  %s2197_s14 = scalar_lea.vmem %s62_s28, 32 }
  0x1f   :  { %p2194_p11 = scmp.ne.s32.totalorder %s62_s28, %s2193_s1  ;;  %p2198_p12 = scmp.lt.s32.totalorder %s62_s28, %s62_s28 }
  0x20   :  { %p2199_p13 = scmp.lt.s32.totalorder %s2197_s14, %s2193_s1 }
  0x22   :  { %p2200_p0 = por %p2199_p13, %p2198_p12 }
  0x24   :  { %p2201_p1 = pnand %p2200_p0, %p2194_p11 }
  0x26   :  { %2204 = shalt.err (!%p2201_p1)
}
  0x27   :  { %64 = dma.hbm_to_vmem [thread:$0]  %s3069_s4, 16, %s62_s28, [#allocation9]  }
  0x28   :  { %s2205_s25 = scalar_lea.hbm %s3071_s6, 128 }
  0x29   :  { %p2206_p2 = scmp.ne.s32.totalorder %s3071_s6, %s2205_s25  ;;  %p2209_p3 = scmp.lt.u32.totalorder %s2205_s25, %s3071_s6 }
  0x2b   :  { %p2211_p4 = pnand %p2209_p3, %p2206_p2 }
  0x2d   :  { %2214 = shalt.err (!%p2211_p4)
}
  0x2e   :  { %s2215_s12 = scalar_lea.vmem %s84_s30, 128  ;;  %p2220_p6 = scmp.lt.s32.totalorder %s84_s30, %s84_s30 }
  0x2f   :  { %p2216_p5 = scmp.ne.s32.totalorder %s84_s30, %s2215_s12  ;;  %p2221_p7 = scmp.lt.s32.totalorder %s2215_s12, %s2215_s12 }
  0x31   :  { %p2222_p8 = por %p2221_p7, %p2220_p6 }
  0x33   :  { %p2223_p9 = pnand %p2222_p8, %p2216_p5 }
  0x35   :  { %2226 = shalt.err (!%p2223_p9)
}
  0x36   :  { %86 = dma.hbm_to_vmem [thread:$0]  %s3071_s6, 128, %s84_s30, [#allocation12]  }
  0x37   :  { %s2398_s13 = smov [#allocation14]   ;;  %s2399_s16 = smov [#allocation2]  }
  0x38   :  { %s102_s15 = sshll.u32 %s2398_s13, 4  ;;  %s27_s17 = sshll.u32 %s2399_s16, 4  ;;  %s103_s15 = int_to_ptr.vmem [resolvable:$true] %s102_s15  ;;  %s28_s17 = int_to_ptr.vmem [resolvable:$true] %s27_s17 }
  0x39   :  { %s2227_s14 = scalar_lea.hbm %s3073_s8, 1024 }
  0x3a   :  { %p2228_p10 = scmp.ne.s32.totalorder %s3073_s8, %s2227_s14  ;;  %p2231_p11 = scmp.lt.u32.totalorder %s2227_s14, %s3073_s8 }
  0x3c   :  { %p2233_p12 = pnand %p2231_p11, %p2228_p10 }
  0x3e   :  { %2236 = shalt.err (!%p2233_p12)
}
  0x3f   :  { %s2237_s6 = scalar_lea.vmem %s103_s15, 1024  ;;  %p2242_p0 = scmp.lt.s32.totalorder %s103_s15, %s103_s15 }
  0x40   :  { %p2238_p13 = scmp.ne.s32.totalorder %s103_s15, %s2237_s6  ;;  %p2243_p1 = scmp.lt.s32.totalorder %s2237_s6, %s2237_s6 }
  0x42   :  { %p2244_p2 = por %p2243_p1, %p2242_p0 }
  0x44   :  { %p2245_p3 = pnand %p2244_p2, %p2238_p13 }
  0x46   :  { %2248 = shalt.err (!%p2245_p3)
}
  0x47   :  { %108 = dma.hbm_to_vmem [thread:$0]  %s3073_s8, 1024, %s103_s15, [#allocation15], %s2394_s23, %s2394_s23, %s2395_s24  }
  0x48   :  { %s2249_s29 = scalar_lea.hbm %s3065_s0, 64 }
  0x49   :  { %p2250_p4 = scmp.ne.s32.totalorder %s3065_s0, %s2249_s29  ;;  %p2253_p5 = scmp.lt.u32.totalorder %s2249_s29, %s3065_s0 }
  0x4b   :  { %p2255_p6 = pnand %p2253_p5, %p2250_p4 }
  0x4d   :  { %2258 = shalt.err (!%p2255_p6)
}
  0x4e   :  { %s2259_s13 = scalar_lea.vmem %s28_s17, 64  ;;  %p2264_p8 = scmp.lt.s32.totalorder %s28_s17, %s28_s17 }
  0x4f   :  { %p2260_p7 = scmp.ne.s32.totalorder %s28_s17, %s2259_s13  ;;  %p2265_p9 = scmp.lt.s32.totalorder %s2259_s13, %s2259_s13 }
  0x51   :  { %p2266_p10 = por %p2265_p9, %p2264_p8 }
  0x53   :  { %p2267_p11 = pnand %p2266_p10, %p2260_p7 }
  0x55   :  { %2270 = shalt.err (!%p2267_p11)
}
  0x56   :  { %30 = dma.hbm_to_vmem [thread:$0]  %s3065_s0, 64, %s28_s17, [#allocation3]  }
  0x57   :  { %s2400_s24 = smov [#allocation7]   ;;  %s2401_s16 = smov [#allocation10]  }
  0x58   :  { %s49_s15 = sshll.u32 %s2400_s24, 4  ;;  %s70_s18 = sshll.u32 %s2401_s16, 4  ;;  %s50_s15 = int_to_ptr.vmem [resolvable:$true] %s49_s15  ;;  %s71_s18 = int_to_ptr.vmem [resolvable:$true] %s70_s18 }
  0x59   :  { %s2271_s19 = scalar_lea.hbm %s3067_s2, 16 }
  0x5a   :  { %p2272_p12 = scmp.ne.s32.totalorder %s3067_s2, %s2271_s19  ;;  %p2275_p13 = scmp.lt.u32.totalorder %s2271_s19, %s3067_s2 }
  0x5c   :  { %p2277_p0 = pnand %p2275_p13, %p2272_p12 }
  0x5e   :  { %2280 = shalt.err (!%p2277_p0)
}
  0x5f   :  { %s2281_s0 = scalar_lea.vmem %s50_s15, 16  ;;  %s2285_s17 = scalar_lea.vmem %s50_s15, 32 }
  0x60   :  { %p2282_p1 = scmp.ne.s32.totalorder %s50_s15, %s2281_s0  ;;  %p2286_p2 = scmp.lt.s32.totalorder %s50_s15, %s50_s15 }
  0x61   :  { %p2287_p3 = scmp.lt.s32.totalorder %s2285_s17, %s2281_s0 }
  0x63   :  { %p2288_p4 = por %p2287_p3, %p2286_p2 }
  0x65   :  { %p2289_p5 = pnand %p2288_p4, %p2282_p1 }
  0x67   :  { %2292 = shalt.err (!%p2289_p5)
}
  0x68   :  { %52 = dma.hbm_to_vmem [thread:$0]  %s3067_s2, 16, %s50_s15, [#allocation6]  }
  0x69   :  { %s2293_s29 = scalar_lea.hbm %s3070_s5, 49152 }
  0x6a   :  { %p2294_p6 = scmp.ne.s32.totalorder %s3070_s5, %s2293_s29  ;;  %p2297_p7 = scmp.lt.u32.totalorder %s2293_s29, %s3070_s5 }
  0x6c   :  { %p2299_p8 = pnand %p2297_p7, %p2294_p6 }
  0x6e   :  { %2302 = shalt.err (!%p2299_p8)
}
  0x6f   :  { %s2303_s13 = scalar_lea.vmem %s71_s18, 49152  ;;  %p2308_p10 = scmp.lt.s32.totalorder %s71_s18, %s71_s18 }
  0x70   :  { %p2304_p9 = scmp.ne.s32.totalorder %s71_s18, %s2303_s13  ;;  %p2309_p11 = scmp.lt.s32.totalorder %s2303_s13, %s2303_s13 }
  0x72   :  { %p2310_p12 = por %p2309_p11, %p2308_p10 }
  0x74   :  { %p2311_p13 = pnand %p2310_p12, %p2304_p9 }
  0x76   :  { %2314 = shalt.err (!%p2311_p13)
}
  0x77   :  { %s2402_s2 = smov 1024   ;;  %s2403_s8 = smov 64  }
  0x78   :  { %76 = dma.hbm_to_vmem [thread:$0]  %s3070_s5, 49152, %s71_s18, [#allocation9], %s2402_s2, %s2402_s2, %s2403_s8  }
  0x79   :  { %s2404_s15 = smov [#allocation13]   ;;  %s2405_s1 = smov [#allocation16]  }
  0x7a   :  { %s93_s16 = sshll.u32 %s2404_s15, 4  ;;  %s115_s14 = sshll.u32 %s2405_s1, 4  ;;  %s94_s16 = int_to_ptr.vmem [resolvable:$true] %s93_s16  ;;  %s116_s14 = int_to_ptr.vmem [resolvable:$true] %s115_s14 }
  0x7b   :  { %s2315_s21 = scalar_lea.hbm %s3072_s7, 256 }
  0x7c   :  { %p2316_p0 = scmp.ne.s32.totalorder %s3072_s7, %s2315_s21  ;;  %p2319_p1 = scmp.lt.u32.totalorder %s2315_s21, %s3072_s7 }
  0x7e   :  { %p2321_p2 = pnand %p2319_p1, %p2316_p0 }
  0x80   :  { %2324 = shalt.err (!%p2321_p2)
}
  0x81   :  { %s2325_s5 = scalar_lea.vmem %s94_s16, 256  ;;  %p2330_p4 = scmp.lt.s32.totalorder %s94_s16, %s94_s16 }
  0x82   :  { %p2326_p3 = scmp.ne.s32.totalorder %s94_s16, %s2325_s5  ;;  %p2331_p5 = scmp.lt.s32.totalorder %s2325_s5, %s2325_s5 }
  0x84   :  { %p2332_p6 = por %p2331_p5, %p2330_p4 }
  0x86   :  { %p2333_p7 = pnand %p2332_p6, %p2326_p3 }
  0x88   :  { %2336 = shalt.err (!%p2333_p7)
}
  0x89   :  { %96 = dma.hbm_to_vmem [thread:$0]  %s3072_s7, 256, %s94_s16, [#allocation12]  }
  0x8a   :  { %s2337_s27 = scalar_lea.hbm %s3074_s9, 16 }
  0x8b   :  { %p2338_p8 = scmp.ne.s32.totalorder %s3074_s9, %s2337_s27  ;;  %p2341_p9 = scmp.lt.u32.totalorder %s2337_s27, %s3074_s9 }
  0x8d   :  { %p2343_p10 = pnand %p2341_p9, %p2338_p8 }
  0x8f   :  { %2346 = shalt.err (!%p2343_p10)
}
  0x90   :  { %s2347_s28 = scalar_lea.vmem %s116_s14, 16  ;;  %s2351_s13 = scalar_lea.vmem %s116_s14, 32 }
  0x91   :  { %p2348_p11 = scmp.ne.s32.totalorder %s116_s14, %s2347_s28  ;;  %p2352_p12 = scmp.lt.s32.totalorder %s116_s14, %s116_s14 }
  0x92   :  { %p2353_p13 = scmp.lt.s32.totalorder %s2351_s13, %s2347_s28 }
  0x94   :  { %p2354_p0 = por %p2353_p13, %p2352_p12 }
  0x96   :  { %p2355_p1 = pnand %p2354_p0, %p2348_p11 }
  0x98   :  { %2358 = shalt.err (!%p2355_p1)
}
  0x99   :  { %118 = dma.hbm_to_vmem [thread:$0]  %s3074_s9, 16, %s116_s14, [#allocation15]  }
  0x9a   :  { %2381 = dma.done.wait [#allocation3], 64  }
  0x9b   :  { %2382 = vsyncadd [#allocation3], 4294967232 }
  0x9c   :  { %2383 = dma.done.wait [#allocation6], 528  }
  0x9d   :  { %2384 = vsyncadd [#allocation6], 4294966768 }
  0x9e   :  { %2385 = dma.done.wait [#allocation9], 49168  }
  0x9f   :  { %2386 = vsyncadd [#allocation9], 4294918128 }
  0xa0   :  { %2387 = dma.done.wait [#allocation12], 384  }
  0xa1   :  { %2388 = vsyncadd [#allocation12], 4294966912 }
  0xa2   :  { %2389 = dma.done.wait [#allocation15], 1040  }
  0xa3   :  { %2390 = vsyncadd [#allocation15], 4294966256  ;;  %v2406_v0 = vmov 0.0|0.0   ;;  %vm2407_vm0 = vmmov 0   ;;  %v2408_v1 = vmov 0.0   ;;  %v147_v2 = vld [vmem:[#allocation5] sm:$0xff]  ;;  %v317_v20 = vlaneseq }
  0xa4   :  { %2043 = vmatprep.subr.bf16.mxu0 %v2406_v0  ;;  %2010 = vmatprep.mubr.msk.f32.mxu0 %vm2407_vm0, %v2408_v1  ;;  %v148_v3 = vld [vmem:[#allocation5 + $0x8] sm:$0xff]  ;;  %v149_v4 = vld [vmem:[#allocation5 + $0x10] sm:$0xff]  ;;  %v150_v6 = vld [vmem:[#allocation5 + $0x18] sm:$0xff]  ;;  %vm158_vm1 = vcmask 261120   ;;  %vm321_vm3 = vcmask 44032   ;;  %vm333_vm6 = vcmask 48128  }
  0xa5   :  { %v2044_v5 = vpack.c.bf16 %v148_v3, %v147_v2  ;;  %v2047_v7 = vpack.c.bf16 %v150_v6, %v149_v4  ;;  %v233_v8 = vld [vmem:[%s3068_s3] sm:$0xff]  ;;  %v234_v9 = vld [vmem:[%s3068_s3 + $0x8] sm:$0xff]  ;;  %v235_v12 = vld [vmem:[%s3068_s3 + $0x10] sm:$0xff]  ;;  %v2602_v21 = vshrl.u32 %v317_v20, 7  ;;  %v330_v31 = vand.u32 127, %v317_v20 }
  0xa6   :  { %v146_v10 = vld [vmem:[#allocation2] sm:$0xf]  ;;  %v2050_v11 = vpack.c.bf16 %v234_v9, %v233_v8  ;;  %v236_v13 = vld [vmem:[%s3068_s3 + $0x18] sm:$0xff]  ;;  %v1977_v15 = vld [vmem:[#allocation7] ss:$0 sm:$0xff]  ;;  %vm1883_vm11 = vcmask 523264  }
  0xa7   :  { %2045 = vmatpush3.bf16.msra.mxu0 %v2044_v5  ;;  %v2053_v14 = vpack.c.bf16 %v236_v13, %v235_v12  ;;  %v1979_v22 = vld [vmem:[#allocation8] ss:$0 sm:$0xff]  ;;  %vm319_vm2 = vcmp.eq.s32.totalorder %v2602_v21, 3  ;;  %vm733_vm4 = vcmp.eq.s32.totalorder %v330_v31, 2  ;;  %vm331_vm5 = vcmp.eq.s32.totalorder %v330_v31, 0  ;;  %v338_v55 = vld [vmem:[#allocation10 + $0x8] sm:$0xff] }
  0xa8   :  { %2046 = vmatprep.subr.bf16.mxu0 %v2406_v0  ;;  %vm934_vm7 = vcmp.eq.s32.totalorder %v330_v31, 3  ;;  %vm532_vm8 = vcmp.eq.s32.totalorder %v330_v31, 1  ;;  %vm1336_vm9 = vcmp.eq.s32.totalorder %v330_v31, 5  ;;  %vm1135_vm10 = vcmp.eq.s32.totalorder %v330_v31, 4  ;;  %v346_v56 = vld [vmem:[#allocation10 + $0x48] sm:$0xff]  ;;  %v337_v63 = vld [vmem:[#allocation10] sm:$0xff] }
  0xa9   :  { %v2409_v47 = vmov 1983009808   ;;  %v2611_v50 = vld.sshfl [vmem:[#allocation13] sm:$0xff pattern:$0x76325410]  ;;  %v345_v2 = vld [vmem:[#allocation10 + $0x40] sm:$0xff] }
  0xaa   :  { %v1547_v48 = vunpack.c.l.s4 %v2409_v47  ;;  %v2613_v51 = vld.sshfl [vmem:[#allocation13 + $0x8] sm:$0xff pattern:$0x76325410]  ;;  %v1560_v53 = vcombine.high %v2611_v50, %v2611_v50  ;;  %v740_v57 = vld [vmem:[#allocation10 + $0x408] sm:$0xff]  ;;  %v747_v8 = vld [vmem:[#allocation10 + $0x440] sm:$0xff]  ;;  %s2410_s3 = smov [#allocation17]  }
  0xab   :  { %2048 = vmatpush3.bf16.msra.mxu0 %v2047_v7  ;;  %v1577_v54 = vcombine.high %v2613_v51, %v2613_v51  ;;  %v748_v58 = vld [vmem:[#allocation10 + $0x448] sm:$0xff]  ;;  %v739_v7 = vld [vmem:[#allocation10 + $0x400] sm:$0xff]  ;;  %s1964_s19 = sshll.u32 %s2410_s3, 4  ;;  %s1965_s19 = int_to_ptr.vmem [resolvable:$true] %s1964_s19 }
  0xac   :  { %2049 = vmatprep.subr.bf16.mxu0 %v2406_v0  ;;  %v1548_v49 = vunpack.c.0.s8 %v1547_v48  ;;  %1651 = vmatprep.mubr.f32.mxu1 %v1560_v53  ;;  %v342_v59 = vld [vmem:[#allocation10 + $0x28] sm:$0xff]  ;;  %v341_v12 = vld [vmem:[#allocation10 + $0x20] sm:$0xff]  ;;  %s2359_s20 = scalar_lea.vmem %s1965_s19, 32  ;;  %p2364_p3 = scmp.lt.s32.totalorder %s1965_s19, %s1965_s19 }
  0xad   :  { %v350_v60 = vld [vmem:[#allocation10 + $0x68] sm:$0xff]  ;;  %v349_v13 = vld [vmem:[#allocation10 + $0x60] sm:$0xff]  ;;  %p2360_p2 = scmp.ne.s32.totalorder %s1965_s19, %s2359_s20  ;;  %p2365_p4 = scmp.lt.s32.totalorder %s2359_s20, %s2359_s20 }
  0xae   :  { %2011 = vmatmul.mubr.msk.f32.vlgmr.msra.gmra.mrb[0].mxu0 %vm158_vm1, %v146_v10  ;;  %v2616_v52 = vsub.s32 %v1548_v49, %v2602_v21  ;;  %v744_v61 = vld [vmem:[#allocation10 + $0x428] sm:$0xff]  ;;  %v948_v49 = vld [vmem:[#allocation10 + $0x640] sm:$0xff] }
  0xaf   :  { %2051 = vmatpush3.bf16.msra.mxu0 %v2050_v11  ;;  %2021 = vmatprep.mubr.msk.f32.mxu0 %vm2407_vm0, %v2408_v1  ;;  %v752_v62 = vld [vmem:[#allocation10 + $0x468] sm:$0xff]  ;;  %p2366_p5 = por %p2365_p4, %p2364_p3 }
  0xb0   :  { %2052 = vmatprep.subr.bf16.mxu0 %v2406_v0  ;;  %v539_v5 = vld [vmem:[#allocation10 + $0x208] sm:$0xff] }
  0xb1   :  { %v547_v6 = vld [vmem:[#allocation10 + $0x248] sm:$0xff]  ;;  %p2367_p6 = pnand %p2366_p5, %p2360_p2 }
  0xb3   :  { %2054 = vmatpush3.bf16.msra.mxu0 %v2053_v14  ;;  %v743_v14 = vld [vmem:[#allocation10 + $0x420] sm:$0xff] }
 0x181   :  { %v228_v16 = vpop.f32.mrb[0].mxu0 }
 0x182   :  { %v229_v17 = vadd.f32 %v1977_v15, %v228_v16  ;;  %v2012_v18 = vpop.f32.mrb[1].mxu0  ;;  %v941_v16 = vld [vmem:[#allocation10 + $0x608] sm:$0xff] }
 0x184   :  { %v232_v19 = vmax.f32 %v229_v17, 0.0  ;;  %v949_v17 = vld [vmem:[#allocation10 + $0x648] sm:$0xff] }
 0x186   :  { %2022 = vmatmul.mubr.msk.f32.vlgmr.msra.gmra.mrb[2].mxu0 %vm158_vm1, %v232_v19 }
 0x187   :  { %1791 = vmatprep.mubr.f32.mxu0 %v1577_v54 }
 0x259   :  { %v313_v23 = vpop.f32.mrb[2].mxu0 }
 0x25a   :  { %v314_v24 = vadd.f32 %v1979_v22, %v313_v23  ;;  %v2023_v25 = vpop.f32.mrb[3].mxu0  ;;  %v751_v22 = vld [vmem:[#allocation10 + $0x460] sm:$0xff]  ;;  %v543_v23 = vld [vmem:[#allocation10 + $0x228] sm:$0xff] }
 0x25c   :  { %v320_v26 = vsel %vm319_vm2, %v314_v24, 0.0  ;;  %v551_v24 = vld [vmem:[#allocation10 + $0x268] sm:$0xff] }
 0x25d   :  { %v322_v27 = vsel %vm321_vm3, %v320_v26, 0.0  ;;  %v945_v26 = vld [vmem:[#allocation10 + $0x628] sm:$0xff] }
 0x25e   :  { %v323_v28 = vrot.slane %v322_v27, 4 }
 0x260   :  { %v324_v29 = vadd.f32 %v323_v28, %v322_v27 }
 0x262   :  { %v325_v30 = vrot.slane %v324_v29, 2 }
 0x264   :  { %v326_v32 = vadd.f32 %v325_v30, %v324_v29 }
 0x266   :  { %v327_v33 = vrot.slane %v326_v32, 1 }
 0x268   :  { %v328_v34 = vadd.f32 %v327_v33, %v326_v32  ;;  %v953_v32 = vld [vmem:[#allocation10 + $0x668] sm:$0xff]  ;;  %v538_v33 = vld [vmem:[#allocation10 + $0x200] sm:$0xff] }
 0x26a   :  { %v734_v35 = vsel %vm733_vm4, %v328_v34, 0.0  ;;  %v332_v36 = vsel %vm331_vm5, %v328_v34, 0.0  ;;  %v935_v39 = vsel %vm934_vm7, %v328_v34, 0.0  ;;  %v533_v40 = vsel %vm532_vm8, %v328_v34, 0.0 }
 0x26b   :  { %v735_v37 = vsel %vm333_vm6, %v734_v35, 0.0  ;;  %v334_v38 = vsel %vm333_vm6, %v332_v36, 0.0  ;;  %v936_v41 = vsel %vm333_vm6, %v935_v39, 0.0  ;;  %v534_v42 = vsel %vm333_vm6, %v533_v40, 0.0 }
 0x26c   :  { %736 = vadd.xlane.f32.xlu1 %v735_v37  ;;  %335 = vadd.xlane.f32.xlu0 %v334_v38  ;;  %v1337_v43 = vsel %vm1336_vm9, %v328_v34, 0.0  ;;  %v1136_v44 = vsel %vm1135_vm10, %v328_v34, 0.0 }
 0x26d   :  { %v1338_v45 = vsel %vm333_vm6, %v1337_v43, 0.0  ;;  %v1137_v46 = vsel %vm333_vm6, %v1136_v44, 0.0 }
 0x270   :  { %937 = vadd.xlane.f32.xlu1 %v936_v41  ;;  %535 = vadd.xlane.f32.xlu0 %v534_v42  ;;  %v546_v41 = vld [vmem:[#allocation10 + $0x240] sm:$0xff] }
 0x271   :  { %v940_v42 = vld [vmem:[#allocation10 + $0x600] sm:$0xff] }
 0x274   :  { %1339 = vadd.xlane.f32.xlu1 %v1338_v45  ;;  %1138 = vadd.xlane.f32.xlu0 %v1137_v46  ;;  %v1142_v45 = vld [vmem:[#allocation10 + $0x808] sm:$0xff] }
 0x2f9   :  { %v2622_v3 = vpop.xlane.xlu1 %736  ;;  %v2624_v4 = vpop.xlane.xlu0 %335 }
 0x2fa   :  { %v402_v9 = vmul.f32 %v338_v55, %v2624_v4  ;;  %v410_v10 = vmul.f32 %v346_v56, %v2624_v4  ;;  %v804_v11 = vmul.f32 %v740_v57, %v2622_v3  ;;  %v812_v15 = vmul.f32 %v748_v58, %v2622_v3  ;;  %v1150_v55 = vld [vmem:[#allocation10 + $0x848] sm:$0xff] }
 0x2fb   :  { %v406_v18 = vmul.f32 %v342_v59, %v2624_v4  ;;  %v414_v19 = vmul.f32 %v350_v60, %v2624_v4  ;;  %v808_v20 = vmul.f32 %v744_v61, %v2622_v3  ;;  %v816_v25 = vmul.f32 %v752_v62, %v2622_v3  ;;  %v1343_v56 = vld [vmem:[#allocation10 + $0xa08] sm:$0xff] }
 0x2fc   :  { %v401_v27 = vmul.f32 %v337_v63, %v2624_v4  ;;  %v409_v28 = vmul.f32 %v345_v2, %v2624_v4  ;;  %v2637_v29 = vmul.f32 %v739_v7, %v2622_v3  ;;  %v2644_v34 = vmul.f32 %v747_v8, %v2622_v3  ;;  %v1351_v61 = vld [vmem:[#allocation10 + $0xa48] sm:$0xff] }
 0x2fd   :  { %v2639_v30 = vpop.xlane.xlu1 %937  ;;  %v2641_v31 = vpop.xlane.xlu0 %535  ;;  %v2647_v35 = vmul.f32 %v341_v12, %v2624_v4  ;;  %v2650_v36 = vmul.f32 %v349_v13, %v2624_v4  ;;  %v2653_v37 = vmul.f32 %v743_v14, %v2622_v3  ;;  %v2659_v43 = vmul.f32 %v751_v22, %v2622_v3  ;;  %v1146_v2 = vld [vmem:[#allocation10 + $0x828] sm:$0xff] }
 0x2fe   :  { %v603_v38 = vmul.f32 %v539_v5, %v2641_v31  ;;  %v611_v39 = vmul.f32 %v547_v6, %v2641_v31  ;;  %v1005_v40 = vmul.f32 %v941_v16, %v2639_v30  ;;  %v1013_v44 = vmul.f32 %v949_v17, %v2639_v30  ;;  %v1347_v12 = vld [vmem:[#allocation10 + $0xa28] sm:$0xff] }
 0x2ff   :  { %v607_v46 = vmul.f32 %v543_v23, %v2641_v31  ;;  %v615_v47 = vmul.f32 %v551_v24, %v2641_v31  ;;  %v1009_v48 = vmul.f32 %v945_v26, %v2639_v30  ;;  %v1017_v57 = vmul.f32 %v953_v32, %v2639_v30 }
 0x300   :  { %v667_v53 = vadd.f32 %v603_v38, %v402_v9  ;;  %v675_v54 = vadd.f32 %v611_v39, %v410_v10  ;;  %v602_v58 = vmul.f32 %v538_v33, %v2641_v31  ;;  %v610_v5 = vmul.f32 %v546_v41, %v2641_v31  ;;  %v1154_v10 = vld [vmem:[#allocation10 + $0x868] sm:$0xff] }
 0x301   :  { %v2667_v59 = vpop.xlane.xlu1 %1339  ;;  %v2669_v60 = vpop.xlane.xlu0 %1138  ;;  %v671_v62 = vadd.f32 %v607_v46, %v406_v18  ;;  %v679_v63 = vadd.f32 %v615_v47, %v414_v19  ;;  %v1004_v6 = vmul.f32 %v940_v42, %v2639_v30  ;;  %v1012_v13 = vmul.f32 %v948_v49, %v2639_v30  ;;  %v542_v49 = vld [vmem:[#allocation10 + $0x220] sm:$0xff] }
 0x302   :  { %v868_v7 = vadd.f32 %v804_v11, %v667_v53  ;;  %v876_v8 = vadd.f32 %v812_v15, %v675_v54  ;;  %v1206_v9 = vmul.f32 %v1142_v45, %v2669_v60  ;;  %v1214_v14 = vmul.f32 %v1150_v55, %v2669_v60  ;;  %v1355_v11 = vld [vmem:[#allocation10 + $0xa68] sm:$0xff]  ;;  %v1141_v15 = vld [vmem:[#allocation10 + $0x800] sm:$0xff] }
 0x303   :  { %v1407_v16 = vmul.f32 %v1343_v56, %v2667_v59  ;;  %v872_v17 = vadd.f32 %v808_v20, %v671_v62  ;;  %v880_v18 = vadd.f32 %v816_v25, %v679_v63  ;;  %v1415_v23 = vmul.f32 %v1351_v61, %v2667_v59  ;;  %v1149_v20 = vld [vmem:[#allocation10 + $0x840] sm:$0xff] }
 0x304   :  { %v1069_v19 = vadd.f32 %v1005_v40, %v868_v7  ;;  %v1077_v22 = vadd.f32 %v1013_v44, %v876_v8  ;;  %v1210_v24 = vmul.f32 %v1146_v2, %v2669_v60  ;;  %v1218_v33 = vmul.f32 %v1154_v10, %v2669_v60  ;;  %v1342_v25 = vld [vmem:[#allocation10 + $0xa00] sm:$0xff] }
 0x305   :  { %v1073_v26 = vadd.f32 %v1009_v48, %v872_v17  ;;  %v1081_v32 = vadd.f32 %v1017_v57, %v880_v18  ;;  %v1411_v38 = vmul.f32 %v1347_v12, %v2667_v59  ;;  %v666_v42 = vadd.f32 %v602_v58, %v401_v27  ;;  %v1350_v56 = vld [vmem:[#allocation10 + $0xa40] sm:$0xff]  ;;  %v354_v17 = vld [vmem:[#allocation10 + $0x88] sm:$0xff] }
 0x306   :  { %v1270_v39 = vadd.f32 %v1206_v9, %v1069_v19  ;;  %v1278_v41 = vadd.f32 %v1214_v14, %v1077_v22  ;;  %v674_v45 = vadd.f32 %v610_v5, %v409_v28  ;;  %v1419_v46 = vmul.f32 %v1355_v11, %v2667_v59  ;;  %v550_v57 = vld [vmem:[#allocation10 + $0x260] sm:$0xff] }
 0x307   :  { %v1274_v40 = vadd.f32 %v1210_v24, %v1073_v26  ;;  %v1282_v44 = vadd.f32 %v1218_v33, %v1081_v32  ;;  %v1205_v47 = vmul.f32 %v1141_v15, %v2669_v60  ;;  %v867_v54 = vadd.f32 %v2637_v29, %v666_v42  ;;  %v944_v61 = vld [vmem:[#allocation10 + $0x620] sm:$0xff]  ;;  %v563_v24 = vld [vmem:[#allocation10 + $0x2c8] sm:$0xff] }
 0x308   :  { %v1471_v53 = vadd.f32 %v1407_v16, %v1270_v39  ;;  %v1479_v48 = vadd.f32 %v1415_v23, %v1278_v41  ;;  %v875_v55 = vadd.f32 %v2644_v34, %v674_v45  ;;  %v1213_v58 = vmul.f32 %v1149_v20, %v2669_v60  ;;  %v952_v63 = vld [vmem:[#allocation10 + $0x660] sm:$0xff]  ;;  %v555_v23 = vld [vmem:[#allocation10 + $0x288] sm:$0xff] }
 0x309   :  { %v1475_v27 = vadd.f32 %v1411_v38, %v1274_v40  ;;  %v1483_v28 = vadd.f32 %v1419_v46, %v1282_v44  ;;  %v1406_v62 = vmul.f32 %v1342_v25, %v2667_v59  ;;  %v1068_v5 = vadd.f32 %v1004_v6, %v867_v54  ;;  %v1145_v9 = vld [vmem:[#allocation10 + $0x820] sm:$0xff]  ;;  %v756_v38 = vld [vmem:[#allocation10 + $0x488] sm:$0xff] }
 0x30a   :  { %v2055_v2 = vpack.c.bf16 %v1479_v48, %v1471_v53  ;;  %v1076_v7 = vadd.f32 %v1012_v13, %v875_v55  ;;  %v606_v8 = vmul.f32 %v542_v49, %v2641_v31  ;;  %v1153_v10 = vld [vmem:[#allocation10 + $0x860] sm:$0xff]  ;;  %v1414_v34 = vmul.f32 %v1350_v56, %v2667_v59  ;;  %v362_v13 = vld [vmem:[#allocation10 + $0xc8] sm:$0xff] }
 0x30b   :  { %v1346_v29 = vld [vmem:[#allocation10 + $0xa20] sm:$0xff]  ;;  %v2087_v12 = vpack.c.bf16 %v1483_v28, %v1475_v27  ;;  %v614_v14 = vmul.f32 %v550_v57, %v2641_v31  ;;  %v1008_v16 = vmul.f32 %v944_v61, %v2639_v30  ;;  %v1269_v18 = vadd.f32 %v1205_v47, %v1068_v5  ;;  %v764_v45 = vld [vmem:[#allocation10 + $0x4c8] sm:$0xff] }
 0x30c   :  { %2056 = vmatprep.subr.bf16.mxu1 %v2055_v2  ;;  %v1277_v19 = vadd.f32 %v1213_v58, %v1076_v7  ;;  %v670_v22 = vadd.f32 %v606_v8, %v2647_v35  ;;  %v1016_v6 = vmul.f32 %v952_v63, %v2639_v30  ;;  %v1209_v15 = vmul.f32 %v1145_v9, %v2669_v60  ;;  %v1354_v32 = vld [vmem:[#allocation10 + $0xa60] sm:$0xff]  ;;  %v957_v44 = vld [vmem:[#allocation10 + $0x688] sm:$0xff] }
 0x30d   :  { %2088 = vmatprep.subr.bf16.mxu0 %v2087_v12  ;;  %v678_v11 = vadd.f32 %v614_v14, %v2650_v36  ;;  %v1217_v26 = vmul.f32 %v1153_v10, %v2669_v60  ;;  %v1410_v33 = vmul.f32 %v1346_v29, %v2667_v59  ;;  %v1470_v39 = vadd.f32 %v1406_v62, %v1269_v18  ;;  %v965_v46 = vld [vmem:[#allocation10 + $0x6c8] sm:$0xff] }
 0x30e   :  { %v1478_v41 = vadd.f32 %v1414_v34, %v1277_v19  ;;  %v871_v35 = vadd.f32 %v2653_v37, %v670_v22  ;;  %v418_v42 = vmul.f32 %v354_v17, %v2624_v4  ;;  %v426_v25 = vmul.f32 %v362_v13, %v2624_v4  ;;  %v1158_v47 = vld [vmem:[#allocation10 + $0x888] sm:$0xff] }
 0x30f   :  { %v879_v20 = vadd.f32 %v2659_v43, %v678_v11  ;;  %v619_v36 = vmul.f32 %v555_v23, %v2641_v31  ;;  %v627_v40 = vmul.f32 %v563_v24, %v2641_v31  ;;  %v1418_v48 = vmul.f32 %v1354_v32, %v2667_v59  ;;  %v1166_v54 = vld [vmem:[#allocation10 + $0x8c8] sm:$0xff] }
 0x310   :  { %v2057_v49 = vpack.c.bf16 %v1478_v41, %v1470_v39  ;;  %v1072_v53 = vadd.f32 %v1008_v16, %v871_v35  ;;  %v820_v37 = vmul.f32 %v756_v38, %v2622_v3  ;;  %v828_v43 = vmul.f32 %v764_v45, %v2622_v3  ;;  %v1359_v61 = vld [vmem:[#allocation10 + $0xa88] sm:$0xff] }
 0x311   :  { %v1080_v55 = vadd.f32 %v1016_v6, %v879_v20  ;;  %v683_v56 = vadd.f32 %v619_v36, %v418_v42  ;;  %v691_v57 = vadd.f32 %v627_v40, %v426_v25  ;;  %v1367_v27 = vld [vmem:[#allocation10 + $0xac8] sm:$0xff]  ;;  %v1021_v62 = vmul.f32 %v957_v44, %v2639_v30  ;;  %v353_v25 = vld [vmem:[#allocation10 + $0x80] sm:$0xff] }
 0x312   :  { %v358_v28 = vld [vmem:[#allocation10 + $0xa8] sm:$0xff]  ;;  %2058 = vmatpush1.bf16.xpose.msra.mxu1 %v2057_v49  ;;  %v1273_v58 = vadd.f32 %v1209_v15, %v1072_v53  ;;  %v1029_v63 = vmul.f32 %v965_v46, %v2639_v30  ;;  %v1222_v2 = vmul.f32 %v1158_v47, %v2669_v60  ;;  %v1230_v29 = vmul.f32 %v1166_v54, %v2669_v60  ;;  %v361_v36 = vld [vmem:[#allocation10 + $0xc0] sm:$0xff] }
 0x313   :  { %v366_v5 = vld [vmem:[#allocation10 + $0xe8] sm:$0xff]  ;;  %v1281_v8 = vadd.f32 %v1217_v26, %v1080_v55  ;;  %v884_v9 = vadd.f32 %v820_v37, %v683_v56  ;;  %v892_v10 = vadd.f32 %v828_v43, %v691_v57  ;;  %v1423_v17 = vmul.f32 %v1359_v61, %v2667_v59  ;;  %v554_v49 = vld [vmem:[#allocation10 + $0x280] sm:$0xff] }
 0x314   :  { %v559_v7 = vld [vmem:[#allocation10 + $0x2a8] sm:$0xff]  ;;  %v1474_v16 = vadd.f32 %v1410_v33, %v1273_v58  ;;  %v1431_v18 = vmul.f32 %v1367_v27, %v2667_v59  ;;  %v422_v19 = vmul.f32 %v358_v28, %v2624_v4  ;;  %v430_v26 = vmul.f32 %v366_v5, %v2624_v4  ;;  %v562_v53 = vld [vmem:[#allocation10 + $0x2c0] sm:$0xff] }
 0x315   :  { %v567_v12 = vld [vmem:[#allocation10 + $0x2e8] sm:$0xff]  ;;  %v1482_v22 = vadd.f32 %v1418_v48, %v1281_v8  ;;  %v1085_v6 = vadd.f32 %v1021_v62, %v884_v9  ;;  %v1093_v13 = vadd.f32 %v1029_v63, %v892_v10  ;;  %v623_v23 = vmul.f32 %v559_v7, %v2641_v31  ;;  %v755_v57 = vld [vmem:[#allocation10 + $0x480] sm:$0xff] }
 0x316   :  { %v760_v34 = vld [vmem:[#allocation10 + $0x4a8] sm:$0xff]  ;;  %v631_v32 = vmul.f32 %v567_v12, %v2641_v31  ;;  %v763_v43 = vld [vmem:[#allocation10 + $0x4c0] sm:$0xff]  ;;  %v417_v28 = vmul.f32 %v353_v25, %v2624_v4  ;;  %v425_v58 = vmul.f32 %v361_v36, %v2624_v4  ;;  %v618_v5 = vmul.f32 %v554_v49, %v2641_v31 }
 0x317   :  { %v768_v14 = vld [vmem:[#allocation10 + $0x4e8] sm:$0xff]  ;;  %v824_v33 = vmul.f32 %v760_v34, %v2622_v3  ;;  %v2089_v41 = vpack.c.bf16 %v1482_v22, %v1474_v16  ;;  %v1286_v35 = vadd.f32 %v1222_v2, %v1085_v6  ;;  %v1294_v42 = vadd.f32 %v1230_v29, %v1093_v13  ;;  %v956_v62 = vld [vmem:[#allocation10 + $0x680] sm:$0xff] }
 0x318   :  { %v961_v24 = vld [vmem:[#allocation10 + $0x6a8] sm:$0xff]  ;;  %v832_v38 = vmul.f32 %v768_v14, %v2622_v3  ;;  %v687_v45 = vadd.f32 %v623_v23, %v422_v19  ;;  %v695_v40 = vadd.f32 %v631_v32, %v430_v26  ;;  %v626_v7 = vmul.f32 %v562_v53, %v2641_v31  ;;  %v964_v8 = vld [vmem:[#allocation10 + $0x6c0] sm:$0xff] }
 0x319   :  { %v969_v11 = vld [vmem:[#allocation10 + $0x6e8] sm:$0xff]  ;;  %v1025_v44 = vmul.f32 %v961_v24, %v2639_v30  ;;  %2090 = vmatpush1.bf16.xpose.msra.mxu0 %v2089_v41  ;;  %v1487_v48 = vadd.f32 %v1423_v17, %v1286_v35  ;;  %v1495_v37 = vadd.f32 %v1431_v18, %v1294_v42  ;;  %v1157_v9 = vld [vmem:[#allocation10 + $0x880] sm:$0xff]  ;;  %v819_v34 = vmul.f32 %v755_v57, %v2622_v3 }
 0x31a   :  { %v1162_v15 = vld [vmem:[#allocation10 + $0x8a8] sm:$0xff]  ;;  %v1033_v46 = vmul.f32 %v969_v11, %v2639_v30  ;;  %v888_v54 = vadd.f32 %v824_v33, %v687_v45  ;;  %v896_v61 = vadd.f32 %v832_v38, %v695_v40  ;;  %v1165_v10 = vld [vmem:[#allocation10 + $0x8c0] sm:$0xff]  ;;  %v827_v14 = vmul.f32 %v763_v43, %v2622_v3 }
 0x31b   :  { %v1170_v39 = vld [vmem:[#allocation10 + $0x8e8] sm:$0xff]  ;;  %v1226_v47 = vmul.f32 %v1162_v15, %v2669_v60  ;;  %v2059_v63 = vpack.c.bf16 %v1495_v37, %v1487_v48  ;;  %v1358_v16 = vld [vmem:[#allocation10 + $0xa80] sm:$0xff]  ;;  %v682_v18 = vadd.f32 %v618_v5, %v417_v28  ;;  %v690_v19 = vadd.f32 %v626_v7, %v425_v58 }
 0x31c   :  { %v1363_v20 = vld [vmem:[#allocation10 + $0xaa8] sm:$0xff]  ;;  %v1234_v55 = vmul.f32 %v1170_v39, %v2669_v60  ;;  %v1089_v2 = vadd.f32 %v1025_v44, %v888_v54  ;;  %v1097_v29 = vadd.f32 %v1033_v46, %v896_v61  ;;  %v1020_v22 = vmul.f32 %v956_v62, %v2639_v30  ;;  %v1366_v6 = vld [vmem:[#allocation10 + $0xac0] sm:$0xff] }
 0x31d   :  { %v1371_v56 = vld [vmem:[#allocation10 + $0xae8] sm:$0xff]  ;;  %v1427_v27 = vmul.f32 %v1363_v20, %v2667_v59  ;;  %2060 = vmatprep.subr.bf16.mxu1 %v2059_v63  ;;  %v357_v13 = vld [vmem:[#allocation10 + $0xa0] sm:$0xff]  ;;  %v1028_v11 = vmul.f32 %v964_v8, %v2639_v30  ;;  %v1221_v15 = vmul.f32 %v1157_v9, %v2669_v60  ;;  %v1229_v26 = vmul.f32 %v1165_v10, %v2669_v60 }
 0x31e   :  { %v1435_v12 = vmul.f32 %v1371_v56, %v2667_v59  ;;  %v1290_v17 = vadd.f32 %v1226_v47, %v1089_v2  ;;  %v558_v23 = vld [vmem:[#allocation10 + $0x2a0] sm:$0xff]  ;;  %v1298_v24 = vadd.f32 %v1234_v55, %v1097_v29  ;;  %v883_v39 = vadd.f32 %v819_v34, %v682_v18  ;;  %v370_v2 = vld [vmem:[#allocation10 + $0x108] sm:$0xff] }
 0x31f   :  { %v365_v32 = vld [vmem:[#allocation10 + $0xe0] sm:$0xff]  ;;  %v891_v41 = vadd.f32 %v827_v14, %v690_v19  ;;  %v1422_v35 = vmul.f32 %v1358_v16, %v2667_v59  ;;  %v1430_v25 = vmul.f32 %v1366_v6, %v2667_v59  ;;  %v421_v36 = vmul.f32 %v357_v13, %v2624_v4  ;;  %v571_v5 = vld [vmem:[#allocation10 + $0x308] sm:$0xff] }
 0x320   :  { %v566_v33 = vld [vmem:[#allocation10 + $0x2e0] sm:$0xff]  ;;  %v1491_v38 = vadd.f32 %v1427_v27, %v1290_v17  ;;  %v1499_v20 = vadd.f32 %v1435_v12, %v1298_v24  ;;  %v622_v40 = vmul.f32 %v558_v23, %v2641_v31  ;;  %v1084_v46 = vadd.f32 %v1020_v22, %v883_v39  ;;  %v378_v29 = vld [vmem:[#allocation10 + $0x148] sm:$0xff] }
 0x321   :  { %v759_v42 = vld [vmem:[#allocation10 + $0x4a0] sm:$0xff]  ;;  %v1092_v47 = vadd.f32 %v1028_v11, %v891_v41  ;;  %v429_v49 = vmul.f32 %v365_v32, %v2624_v4  ;;  %v630_v53 = vmul.f32 %v566_v33, %v2641_v31  ;;  %v579_v12 = vld [vmem:[#allocation10 + $0x348] sm:$0xff]  ;;  %v434_v13 = vmul.f32 %v370_v2, %v2624_v4 }
 0x322   :  { %v767_v45 = vld [vmem:[#allocation10 + $0x4e0] sm:$0xff]  ;;  %v2091_v55 = vpack.c.bf16 %v1499_v20, %v1491_v38  ;;  %v686_v56 = vadd.f32 %v622_v40, %v421_v36  ;;  %v823_v57 = vmul.f32 %v759_v42, %v2622_v3  ;;  %v1285_v27 = vadd.f32 %v1221_v15, %v1084_v46  ;;  %v772_v18 = vld [vmem:[#allocation10 + $0x508] sm:$0xff] }
 0x323   :  { %v960_v44 = vld [vmem:[#allocation10 + $0x6a0] sm:$0xff]  ;;  %v831_v43 = vmul.f32 %v767_v45, %v2622_v3  ;;  %v1293_v28 = vadd.f32 %v1229_v26, %v1092_v47  ;;  %v694_v58 = vadd.f32 %v630_v53, %v429_v49  ;;  %v780_v19 = vld [vmem:[#allocation10 + $0x548] sm:$0xff]  ;;  %v635_v23 = vmul.f32 %v571_v5, %v2641_v31 }
 0x324   :  { %v968_v48 = vld [vmem:[#allocation10 + $0x6e0] sm:$0xff]  ;;  %v1024_v62 = vmul.f32 %v960_v44, %v2639_v30  ;;  %2092 = vmatprep.subr.bf16.mxu0 %v2091_v55  ;;  %v887_v7 = vadd.f32 %v823_v57, %v686_v56  ;;  %v1486_v34 = vadd.f32 %v1422_v35, %v1285_v27  ;;  %v973_v24 = vld [vmem:[#allocation10 + $0x708] sm:$0xff]  ;;  %v442_v32 = vmul.f32 %v378_v29, %v2624_v4 }
 0x325   :  { %v1161_v37 = vld [vmem:[#allocation10 + $0x8a0] sm:$0xff]  ;;  %v1032_v8 = vmul.f32 %v968_v48, %v2639_v30  ;;  %v1494_v14 = vadd.f32 %v1430_v25, %v1293_v28  ;;  %v895_v16 = vadd.f32 %v831_v43, %v694_v58  ;;  %v981_v11 = vld [vmem:[#allocation10 + $0x748] sm:$0xff]  ;;  %v643_v33 = vmul.f32 %v579_v12, %v2641_v31 }
 0x326   :  { %v1169_v54 = vld [vmem:[#allocation10 + $0x8e0] sm:$0xff]  ;;  %v1225_v9 = vmul.f32 %v1161_v37, %v2669_v60  ;;  %v1088_v22 = vadd.f32 %v1024_v62, %v887_v7  ;;  %v1174_v38 = vld [vmem:[#allocation10 + $0x908] sm:$0xff]  ;;  %v699_v35 = vadd.f32 %v635_v23, %v434_v13  ;;  %v836_v42 = vmul.f32 %v772_v18, %v2622_v3 }
 0x327   :  { %v1362_v61 = vld [vmem:[#allocation10 + $0xaa0] sm:$0xff]  ;;  %v1233_v10 = vmul.f32 %v1169_v54, %v2669_v60  ;;  %v2061_v15 = vpack.c.bf16 %v1494_v14, %v1486_v34  ;;  %v1096_v26 = vadd.f32 %v1032_v8, %v895_v16  ;;  %v1182_v39 = vld [vmem:[#allocation10 + $0x948] sm:$0xff]  ;;  %v844_v45 = vmul.f32 %v780_v19, %v2622_v3 }
 0x328   :  { %v1370_v63 = vld [vmem:[#allocation10 + $0xae0] sm:$0xff]  ;;  %v1426_v17 = vmul.f32 %v1362_v61, %v2667_v59  ;;  %v1289_v41 = vadd.f32 %v1225_v9, %v1088_v22  ;;  %v1375_v20 = vld [vmem:[#allocation10 + $0xb08] sm:$0xff]  ;;  %v707_v40 = vadd.f32 %v643_v33, %v442_v32  ;;  %v1037_v44 = vmul.f32 %v973_v24, %v2639_v30 }
 0x329   :  { %v1434_v6 = vmul.f32 %v1370_v63, %v2667_v59  ;;  %v374_v25 = vld [vmem:[#allocation10 + $0x128] sm:$0xff]  ;;  %2062 = vmatpush1.bf16.xpose.msra.mxu1 %v2061_v15  ;;  %v1297_v36 = vadd.f32 %v1233_v10, %v1096_v26  ;;  %v1045_v46 = vmul.f32 %v981_v11, %v2639_v30  ;;  %v900_v37 = vadd.f32 %v836_v42, %v699_v35  ;;  %v377_v13 = vld [vmem:[#allocation10 + $0x140] sm:$0xff] }
 0x32a   :  { %v382_v47 = vld [vmem:[#allocation10 + $0x168] sm:$0xff]  ;;  %v1490_v48 = vadd.f32 %v1426_v17, %v1289_v41  ;;  %v1238_v54 = vmul.f32 %v1174_v38, %v2669_v60  ;;  %v1246_v55 = vmul.f32 %v1182_v39, %v2669_v60  ;;  %v908_v61 = vadd.f32 %v844_v45, %v707_v40  ;;  %v570_v26 = vld [vmem:[#allocation10 + $0x300] sm:$0xff] }
 0x32b   :  { %v575_v49 = vld [vmem:[#allocation10 + $0x328] sm:$0xff]  ;;  %v1498_v43 = vadd.f32 %v1434_v6, %v1297_v36  ;;  %v1439_v27 = vmul.f32 %v1375_v20, %v2667_v59  ;;  %v438_v28 = vmul.f32 %v374_v25, %v2624_v4  ;;  %v1101_v62 = vadd.f32 %v1037_v44, %v900_v37  ;;  %v369_v6 = vld [vmem:[#allocation10 + $0x100] sm:$0xff] }
 0x32c   :  { %v583_v53 = vld [vmem:[#allocation10 + $0x368] sm:$0xff]  ;;  %v446_v63 = vmul.f32 %v382_v47, %v2624_v4  ;;  %v639_v2 = vmul.f32 %v575_v49, %v2641_v31  ;;  %v1109_v29 = vadd.f32 %v1045_v46, %v908_v61  ;;  %v578_v32 = vld [vmem:[#allocation10 + $0x340] sm:$0xff]  ;;  %v433_v36 = vmul.f32 %v369_v6, %v2624_v4 }
 0x32d   :  { %v1383_v56 = vld [vmem:[#allocation10 + $0xb48] sm:$0xff]  ;;  %v647_v5 = vmul.f32 %v583_v53, %v2641_v31  ;;  %v2093_v10 = vpack.c.bf16 %v1498_v43, %v1490_v48  ;;  %v1302_v16 = vadd.f32 %v1238_v54, %v1101_v62  ;;  %v771_v42 = vld [vmem:[#allocation10 + $0x500] sm:$0xff]  ;;  %v441_v40 = vmul.f32 %v377_v13, %v2624_v4 }
 0x32e   :  { %v776_v57 = vld [vmem:[#allocation10 + $0x528] sm:$0xff]  ;;  %v1447_v12 = vmul.f32 %v1383_v56, %v2667_v59  ;;  %v703_v17 = vadd.f32 %v639_v2, %v438_v28  ;;  %v1310_v23 = vadd.f32 %v1246_v55, %v1109_v29  ;;  %v779_v45 = vld [vmem:[#allocation10 + $0x540] sm:$0xff]  ;;  %v634_v49 = vmul.f32 %v570_v26, %v2641_v31 }
 0x32f   :  { %v784_v58 = vld [vmem:[#allocation10 + $0x568] sm:$0xff]  ;;  %v840_v34 = vmul.f32 %v776_v57, %v2622_v3  ;;  %v711_v18 = vadd.f32 %v647_v5, %v446_v63  ;;  %2094 = vmatpush1.bf16.xpose.msra.mxu0 %v2093_v10  ;;  %v1503_v33 = vadd.f32 %v1439_v27, %v1302_v16  ;;  %v972_v44 = vld [vmem:[#allocation10 + $0x700] sm:$0xff]  ;;  %v642_v53 = vmul.f32 %v578_v32, %v2641_v31 }
 0x330   :  { %v977_v7 = vld [vmem:[#allocation10 + $0x728] sm:$0xff]  ;;  %v848_v19 = vmul.f32 %v784_v58, %v2622_v3  ;;  %v1511_v20 = vadd.f32 %v1447_v12, %v1310_v23  ;;  %v980_v48 = vld [vmem:[#allocation10 + $0x740] sm:$0xff]  ;;  %v835_v57 = vmul.f32 %v771_v42, %v2622_v3  ;;  %v843_v43 = vmul.f32 %v779_v45, %v2622_v3 }
 0x331   :  { %v985_v8 = vld [vmem:[#allocation10 + $0x768] sm:$0xff]  ;;  %v1041_v24 = vmul.f32 %v977_v7, %v2639_v30  ;;  %v904_v38 = vadd.f32 %v840_v34, %v703_v17  ;;  %v1173_v37 = vld [vmem:[#allocation10 + $0x900] sm:$0xff]  ;;  %v698_v58 = vadd.f32 %v634_v49, %v433_v36  ;;  %v706_v62 = vadd.f32 %v642_v53, %v441_v40 }
 0x332   :  { %v1178_v9 = vld [vmem:[#allocation10 + $0x928] sm:$0xff]  ;;  %v1049_v11 = vmul.f32 %v985_v8, %v2639_v30  ;;  %v912_v39 = vadd.f32 %v848_v19, %v711_v18  ;;  %v1181_v54 = vld [vmem:[#allocation10 + $0x940] sm:$0xff]  ;;  %v2063_v55 = vpack.c.bf16 %v1511_v20, %v1503_v33  ;;  %v1036_v7 = vmul.f32 %v972_v44, %v2639_v30 }
 0x333   :  { %v1186_v14 = vld [vmem:[#allocation10 + $0x968] sm:$0xff]  ;;  %v1242_v15 = vmul.f32 %v1178_v9, %v2669_v60  ;;  %v1105_v46 = vadd.f32 %v1041_v24, %v904_v38  ;;  %v373_v61 = vld [vmem:[#allocation10 + $0x120] sm:$0xff]  ;;  %v1044_v8 = vmul.f32 %v980_v48, %v2639_v30  ;;  %v1237_v9 = vmul.f32 %v1173_v37, %v2669_v60 }
 0x334   :  { %v1379_v22 = vld [vmem:[#allocation10 + $0xb28] sm:$0xff]  ;;  %v1250_v41 = vmul.f32 %v1186_v14, %v2669_v60  ;;  %v1113_v47 = vadd.f32 %v1049_v11, %v912_v39  ;;  %v1374_v63 = vld [vmem:[#allocation10 + $0xb00] sm:$0xff]  ;;  %2064 = vmatprep.subr.bf16.mxu1 %v2063_v55  ;;  %v1245_v10 = vmul.f32 %v1181_v54, %v2669_v60  ;;  %v899_v14 = vadd.f32 %v835_v57, %v698_v58 }
 0x335   :  { %v1387_v35 = vld [vmem:[#allocation10 + $0xb68] sm:$0xff]  ;;  %v1443_v25 = vmul.f32 %v1379_v22, %v2667_v59  ;;  %v1306_v27 = vadd.f32 %v1242_v15, %v1105_v46  ;;  %v381_v2 = vld [vmem:[#allocation10 + $0x160] sm:$0xff]  ;;  %v907_v16 = vadd.f32 %v843_v43, %v706_v62  ;;  %v1438_v22 = vmul.f32 %v1374_v63, %v2667_v59 }
 0x336   :  { %v1451_v56 = vmul.f32 %v1387_v35, %v2667_v59  ;;  %v1314_v28 = vadd.f32 %v1250_v41, %v1113_v47  ;;  %v574_v5 = vld [vmem:[#allocation10 + $0x320] sm:$0xff]  ;;  %v437_v6 = vmul.f32 %v373_v61, %v2624_v4  ;;  %v445_v13 = vmul.f32 %v381_v2, %v2624_v4  ;;  %v386_v47 = vld [vmem:[#allocation10 + $0x188] sm:$0xff] }
 0x337   :  { %v582_v29 = vld [vmem:[#allocation10 + $0x360] sm:$0xff]  ;;  %v1507_v12 = vadd.f32 %v1443_v25, %v1306_v27  ;;  %v638_v23 = vmul.f32 %v574_v5, %v2641_v31  ;;  %v1100_v15 = vadd.f32 %v1036_v7, %v899_v14  ;;  %v1108_v26 = vadd.f32 %v1044_v8, %v907_v16  ;;  %v587_v49 = vld [vmem:[#allocation10 + $0x388] sm:$0xff] }
 0x338   :  { %v1515_v34 = vadd.f32 %v1451_v56, %v1314_v28  ;;  %v1382_v17 = vld [vmem:[#allocation10 + $0xb40] sm:$0xff]  ;;  %v646_v32 = vmul.f32 %v582_v29, %v2641_v31  ;;  %v394_v55 = vld [vmem:[#allocation10 + $0x1c8] sm:$0xff]  ;;  %v450_v2 = vmul.f32 %v386_v47, %v2624_v4  ;;  %v651_v5 = vmul.f32 %v587_v49, %v2641_v31 }
 0x339   :  { %v775_v18 = vld [vmem:[#allocation10 + $0x520] sm:$0xff]  ;;  %v1446_v41 = vmul.f32 %v1382_v17, %v2667_v59  ;;  %v702_v35 = vadd.f32 %v638_v23, %v437_v6  ;;  %v1301_v25 = vadd.f32 %v1237_v9, %v1100_v15  ;;  %v1309_v36 = vadd.f32 %v1245_v10, %v1108_v26  ;;  %v595_v56 = vld [vmem:[#allocation10 + $0x3c8] sm:$0xff] }
 0x33a   :  { %v783_v19 = vld [vmem:[#allocation10 + $0x560] sm:$0xff]  ;;  %v2095_v11 = vpack.c.bf16 %v1515_v34, %v1507_v12  ;;  %v839_v42 = vmul.f32 %v775_v18, %v2622_v3  ;;  %v710_v40 = vadd.f32 %v646_v32, %v445_v13  ;;  %v788_v28 = vld [vmem:[#allocation10 + $0x588] sm:$0xff]  ;;  %v458_v29 = vmul.f32 %v394_v55, %v2624_v4 }
 0x33b   :  { %v976_v24 = vld [vmem:[#allocation10 + $0x720] sm:$0xff]  ;;  %v847_v45 = vmul.f32 %v783_v19, %v2622_v3  ;;  %v1502_v57 = vadd.f32 %v1438_v22, %v1301_v25  ;;  %v1510_v43 = vadd.f32 %v1446_v41, %v1309_v36  ;;  %v796_v58 = vld [vmem:[#allocation10 + $0x5c8] sm:$0xff]  ;;  %v659_v12 = vmul.f32 %v595_v56, %v2641_v31 }
 0x33c   :  { %v984_v33 = vld [vmem:[#allocation10 + $0x760] sm:$0xff]  ;;  %2096 = vmatprep.subr.bf16.mxu0 %v2095_v11  ;;  %v1040_v44 = vmul.f32 %v976_v24, %v2639_v30  ;;  %v903_v53 = vadd.f32 %v839_v42, %v702_v35  ;;  %v989_v7 = vld [vmem:[#allocation10 + $0x788] sm:$0xff]  ;;  %v715_v17 = vadd.f32 %v651_v5, %v450_v2  ;;  %v852_v18 = vmul.f32 %v788_v28, %v2622_v3 }
 0x33d   :  { %v1177_v38 = vld [vmem:[#allocation10 + $0x920] sm:$0xff]  ;;  %v1048_v48 = vmul.f32 %v984_v33, %v2639_v30  ;;  %v911_v61 = vadd.f32 %v847_v45, %v710_v40  ;;  %v997_v8 = vld [vmem:[#allocation10 + $0x7c8] sm:$0xff]  ;;  %v2065_v9 = vpack.c.bf16 %v1510_v43, %v1502_v57  ;;  %v860_v19 = vmul.f32 %v796_v58, %v2622_v3 }
 0x33e   :  { %v1185_v39 = vld [vmem:[#allocation10 + $0x960] sm:$0xff]  ;;  %v1241_v37 = vmul.f32 %v1177_v38, %v2669_v60  ;;  %v1104_v62 = vadd.f32 %v1040_v44, %v903_v53  ;;  %v1190_v34 = vld [vmem:[#allocation10 + $0x988] sm:$0xff]  ;;  %v723_v23 = vadd.f32 %v659_v12, %v458_v29  ;;  %v1053_v24 = vmul.f32 %v989_v7, %v2639_v30 }
 0x33f   :  { %v1378_v20 = vld [vmem:[#allocation10 + $0xb20] sm:$0xff]  ;;  %v1249_v54 = vmul.f32 %v1185_v39, %v2669_v60  ;;  %v1112_v10 = vadd.f32 %v1048_v48, %v911_v61  ;;  %v1198_v14 = vld [vmem:[#allocation10 + $0x9c8] sm:$0xff]  ;;  %2066 = vmatpush1.bf16.xpose.msra.mxu1 %v2065_v9  ;;  %v1061_v11 = vmul.f32 %v997_v8, %v2639_v30  ;;  %v916_v38 = vadd.f32 %v852_v18, %v715_v17 }
 0x340   :  { %v1386_v46 = vld [vmem:[#allocation10 + $0xb60] sm:$0xff]  ;;  %v1442_v27 = vmul.f32 %v1378_v20, %v2667_v59  ;;  %v1305_v16 = vadd.f32 %v1241_v37, %v1104_v62  ;;  %v1391_v22 = vld [vmem:[#allocation10 + $0xb88] sm:$0xff]  ;;  %v1254_v39 = vmul.f32 %v1190_v34, %v2669_v60  ;;  %v1262_v41 = vmul.f32 %v1198_v14, %v2669_v60 }
 0x341   :  { %v1450_v63 = vmul.f32 %v1386_v46, %v2667_v59  ;;  %v390_v6 = vld [vmem:[#allocation10 + $0x1a8] sm:$0xff]  ;;  %v1313_v13 = vadd.f32 %v1249_v54, %v1112_v10  ;;  %v924_v20 = vadd.f32 %v860_v19, %v723_v23  ;;  %v1455_v25 = vmul.f32 %v1391_v22, %v2667_v59  ;;  %v393_v2 = vld [vmem:[#allocation10 + $0x1c0] sm:$0xff] }
 0x342   :  { %v398_v15 = vld [vmem:[#allocation10 + $0x1e8] sm:$0xff]  ;;  %v1506_v33 = vadd.f32 %v1442_v27, %v1305_v16  ;;  %v454_v36 = vmul.f32 %v390_v6, %v2624_v4  ;;  %v1117_v44 = vadd.f32 %v1053_v24, %v916_v38  ;;  %v586_v10 = vld [vmem:[#allocation10 + $0x380] sm:$0xff]  ;;  %v457_v23 = vmul.f32 %v393_v2, %v2624_v4 }
 0x343   :  { %v591_v26 = vld [vmem:[#allocation10 + $0x3a8] sm:$0xff]  ;;  %v1514_v45 = vadd.f32 %v1450_v63, %v1313_v13  ;;  %v462_v46 = vmul.f32 %v398_v15, %v2624_v4  ;;  %v1125_v55 = vadd.f32 %v1061_v11, %v924_v20  ;;  %v385_v63 = vld [vmem:[#allocation10 + $0x180] sm:$0xff] }
 0x344   :  { %v599_v32 = vld [vmem:[#allocation10 + $0x3e8] sm:$0xff]  ;;  %v655_v47 = vmul.f32 %v591_v26, %v2641_v31  ;;  %v1318_v61 = vadd.f32 %v1254_v39, %v1117_v44  ;;  %v594_v29 = vld [vmem:[#allocation10 + $0x3c0] sm:$0xff]  ;;  %v449_v13 = vmul.f32 %v385_v63, %v2624_v4  ;;  %v650_v26 = vmul.f32 %v586_v10, %v2641_v31 }
 0x345   :  { %v1399_v35 = vld [vmem:[#allocation10 + $0xbc8] sm:$0xff]  ;;  %v663_v49 = vmul.f32 %v599_v32, %v2641_v31  ;;  %v2097_v54 = vpack.c.bf16 %v1514_v45, %v1506_v33  ;;  %v1326_v5 = vadd.f32 %v1262_v41, %v1125_v55  ;;  %v787_v18 = vld [vmem:[#allocation10 + $0x580] sm:$0xff]  ;;  %v658_v32 = vmul.f32 %v594_v29, %v2641_v31 }
 0x346   :  { %v792_v42 = vld [vmem:[#allocation10 + $0x5a8] sm:$0xff]  ;;  %v1463_v56 = vmul.f32 %v1399_v35, %v2667_v59  ;;  %v719_v27 = vadd.f32 %v655_v47, %v454_v36  ;;  %v1519_v12 = vadd.f32 %v1455_v25, %v1318_v61  ;;  %v795_v19 = vld [vmem:[#allocation10 + $0x5c0] sm:$0xff] }
 0x347   :  { %v800_v40 = vld [vmem:[#allocation10 + $0x5e8] sm:$0xff]  ;;  %v856_v57 = vmul.f32 %v792_v42, %v2622_v3  ;;  %v727_v28 = vadd.f32 %v663_v49, %v462_v46  ;;  %2098 = vmatpush1.bf16.xpose.msra.mxu0 %v2097_v54  ;;  %v988_v24 = vld [vmem:[#allocation10 + $0x780] sm:$0xff]  ;;  %v851_v42 = vmul.f32 %v787_v18, %v2622_v3  ;;  %v859_v45 = vmul.f32 %v795_v19, %v2622_v3 }
 0x348   :  { %v993_v53 = vld [vmem:[#allocation10 + $0x7a8] sm:$0xff]  ;;  %v864_v58 = vmul.f32 %v800_v40, %v2622_v3  ;;  %v1527_v22 = vadd.f32 %v1463_v56, %v1326_v5  ;;  %v996_v33 = vld [vmem:[#allocation10 + $0x7c0] sm:$0xff]  ;;  %v714_v40 = vadd.f32 %v650_v26, %v449_v13  ;;  %v722_v44 = vadd.f32 %v658_v32, %v457_v23  ;;  %v541_v26 = vld [vmem:[#allocation10 + $0x218] sm:$0xff] }
 0x349   :  { %v1001_v48 = vld [vmem:[#allocation10 + $0x7e8] sm:$0xff]  ;;  %v1057_v7 = vmul.f32 %v993_v53, %v2639_v30  ;;  %v920_v34 = vadd.f32 %v856_v57, %v719_v27  ;;  %v1189_v38 = vld [vmem:[#allocation10 + $0x980] sm:$0xff]  ;;  %v1052_v53 = vmul.f32 %v988_v24, %v2639_v30 }
 0x34a   :  { %v1194_v37 = vld [vmem:[#allocation10 + $0x9a8] sm:$0xff]  ;;  %v1065_v8 = vmul.f32 %v1001_v48, %v2639_v30  ;;  %v928_v14 = vadd.f32 %v864_v58, %v727_v28  ;;  %v1197_v39 = vld [vmem:[#allocation10 + $0x9c0] sm:$0xff]  ;;  %v2067_v41 = vpack.c.bf16 %v1527_v22, %v1519_v12  ;;  %v1060_v48 = vmul.f32 %v996_v33, %v2639_v30 }
 0x34b   :  { %v1202_v43 = vld [vmem:[#allocation10 + $0x9e8] sm:$0xff]  ;;  %v1258_v9 = vmul.f32 %v1194_v37, %v2669_v60  ;;  %v1121_v11 = vadd.f32 %v1057_v7, %v920_v34  ;;  %v389_v20 = vld [vmem:[#allocation10 + $0x1a0] sm:$0xff]  ;;  %v1253_v37 = vmul.f32 %v1189_v38, %v2669_v60  ;;  %v1261_v54 = vmul.f32 %v1197_v39, %v2669_v60 }
 0x34c   :  { %v1395_v62 = vld [vmem:[#allocation10 + $0xba8] sm:$0xff]  ;;  %v1266_v16 = vmul.f32 %v1202_v43, %v2669_v60  ;;  %v1129_v15 = vadd.f32 %v1065_v8, %v928_v14  ;;  %v1390_v46 = vld [vmem:[#allocation10 + $0xb80] sm:$0xff]  ;;  %2068 = vmatprep.subr.bf16.mxu1 %v2067_v41  ;;  %v915_v43 = vadd.f32 %v851_v42, %v714_v40  ;;  %v923_v61 = vadd.f32 %v859_v45, %v722_v44  ;;  %v348_v41 = vld [vmem:[#allocation10 + $0x58] sm:$0xff] }
 0x34d   :  { %v1403_v17 = vld [vmem:[#allocation10 + $0xbe8] sm:$0xff]  ;;  %v1459_v6 = vmul.f32 %v1395_v62, %v2667_v59  ;;  %v1322_v25 = vadd.f32 %v1258_v9, %v1121_v11  ;;  %v397_v47 = vld [vmem:[#allocation10 + $0x1e0] sm:$0xff]  ;;  %v1454_v62 = vmul.f32 %v1390_v46, %v2667_v59  ;;  %v453_v63 = vmul.f32 %v389_v20, %v2624_v4  ;;  %v750_v40 = vld [vmem:[#allocation10 + $0x458] sm:$0xff] }
 0x34e   :  { %v1467_v35 = vmul.f32 %v1403_v17, %v2667_v59  ;;  %v1330_v36 = vadd.f32 %v1266_v16, %v1129_v15  ;;  %v590_v49 = vld [vmem:[#allocation10 + $0x3a0] sm:$0xff]  ;;  %v461_v2 = vmul.f32 %v397_v47, %v2624_v4  ;;  %v1116_v9 = vadd.f32 %v1052_v53, %v915_v43  ;;  %v340_v15 = vld [vmem:[#allocation10 + $0x18] sm:$0xff] }
 0x34f   :  { %v598_v55 = vld [vmem:[#allocation10 + $0x3e0] sm:$0xff]  ;;  %v1523_v56 = vadd.f32 %v1459_v6, %v1322_v25  ;;  %v654_v5 = vmul.f32 %v590_v49, %v2641_v31  ;;  %v1124_v10 = vadd.f32 %v1060_v48, %v923_v61  ;;  %v404_v47 = vmul.f32 %v340_v15, %v2624_v4  ;;  %v943_v53 = vld [vmem:[#allocation10 + $0x618] sm:$0xff] }
 0x350   :  { %v1531_v57 = vadd.f32 %v1467_v35, %v1330_v36  ;;  %v1398_v27 = vld [vmem:[#allocation10 + $0xbc0] sm:$0xff]  ;;  %v662_v29 = vmul.f32 %v598_v55, %v2641_v31  ;;  %v1317_v6 = vadd.f32 %v1253_v37, %v1116_v9  ;;  %v549_v35 = vld [vmem:[#allocation10 + $0x258] sm:$0xff]  ;;  %v605_v49 = vmul.f32 %v541_v26, %v2641_v31 }
 0x351   :  { %v791_v28 = vld [vmem:[#allocation10 + $0x5a0] sm:$0xff]  ;;  %v1462_v16 = vmul.f32 %v1398_v27, %v2667_v59  ;;  %v718_v17 = vadd.f32 %v654_v5, %v453_v63  ;;  %v1325_v13 = vadd.f32 %v1261_v54, %v1124_v10  ;;  %v742_v36 = vld [vmem:[#allocation10 + $0x418] sm:$0xff]  ;;  %v412_v55 = vmul.f32 %v348_v41, %v2624_v4 }
 0x352   :  { %v799_v58 = vld [vmem:[#allocation10 + $0x5e0] sm:$0xff]  ;;  %v2099_v8 = vpack.c.bf16 %v1531_v57, %v1523_v56  ;;  %v855_v18 = vmul.f32 %v791_v28, %v2622_v3  ;;  %v726_v23 = vadd.f32 %v662_v29, %v461_v2  ;;  %v1518_v42 = vadd.f32 %v1454_v62, %v1317_v6  ;;  %v951_v48 = vld [vmem:[#allocation10 + $0x658] sm:$0xff] }
 0x353   :  { %v992_v7 = vld [vmem:[#allocation10 + $0x7a0] sm:$0xff]  ;;  %v863_v19 = vmul.f32 %v799_v58, %v2622_v3  ;;  %v1526_v45 = vadd.f32 %v1462_v16, %v1325_v13  ;;  %v613_v56 = vmul.f32 %v549_v35, %v2641_v31  ;;  %v1144_v57 = vld [vmem:[#allocation10 + $0x818] sm:$0xff]  ;;  %v669_v27 = vadd.f32 %v605_v49, %v404_v47  ;;  %v347_v47 = vld [vmem:[#allocation10 + $0x50] sm:$0xff] }
 0x354   :  { %v1000_v12 = vld [vmem:[#allocation10 + $0x7e0] sm:$0xff]  ;;  %2100 = vmatprep.subr.bf16.mxu0 %v2099_v8  ;;  %v1056_v24 = vmul.f32 %v992_v7, %v2639_v30  ;;  %v919_v32 = vadd.f32 %v855_v18, %v718_v17  ;;  %v1152_v43 = vld [vmem:[#allocation10 + $0x858] sm:$0xff]  ;;  %v806_v28 = vmul.f32 %v742_v36, %v2622_v3  ;;  %v814_v58 = vmul.f32 %v750_v40, %v2622_v3 }
 0x355   :  { %v1193_v34 = vld [vmem:[#allocation10 + $0x9a0] sm:$0xff]  ;;  %v1064_v33 = vmul.f32 %v1000_v12, %v2639_v30  ;;  %v927_v20 = vadd.f32 %v863_v19, %v726_v23  ;;  %v2069_v37 = vpack.c.bf16 %v1526_v45, %v1518_v42  ;;  %v1345_v62 = vld [vmem:[#allocation10 + $0xa18] sm:$0xff]  ;;  %v677_v5 = vadd.f32 %v613_v56, %v412_v55  ;;  %v548_v55 = vld [vmem:[#allocation10 + $0x250] sm:$0xff] }
 0x356   :  { %v1201_v14 = vld [vmem:[#allocation10 + $0x9e0] sm:$0xff]  ;;  %v1257_v38 = vmul.f32 %v1193_v34, %v2669_v60  ;;  %v1120_v44 = vadd.f32 %v1056_v24, %v919_v32  ;;  %v344_v63 = vld [vmem:[#allocation10 + $0x38] sm:$0xff]  ;;  %v1007_v7 = vmul.f32 %v943_v53, %v2639_v30  ;;  %v1015_v8 = vmul.f32 %v951_v48, %v2639_v30 }
 0x357   :  { %v1394_v22 = vld [vmem:[#allocation10 + $0xba0] sm:$0xff]  ;;  %v1265_v39 = vmul.f32 %v1201_v14, %v2669_v60  ;;  %v1128_v54 = vadd.f32 %v1064_v33, %v927_v20  ;;  %2070 = vmatpush1.bf16.xpose.msra.mxu1 %v2069_v37  ;;  %v352_v9 = vld [vmem:[#allocation10 + $0x78] sm:$0xff]  ;;  %v870_v34 = vadd.f32 %v806_v28, %v669_v27  ;;  %v1208_v14 = vmul.f32 %v1144_v57, %v2669_v60  ;;  %v741_v28 = vld [vmem:[#allocation10 + $0x410] sm:$0xff] }
 0x358   :  { %v1402_v11 = vld [vmem:[#allocation10 + $0xbe0] sm:$0xff]  ;;  %v1458_v25 = vmul.f32 %v1394_v22, %v2667_v59  ;;  %v1321_v61 = vadd.f32 %v1257_v38, %v1120_v44  ;;  %v545_v10 = vld [vmem:[#allocation10 + $0x238] sm:$0xff]  ;;  %v1216_v16 = vmul.f32 %v1152_v43, %v2669_v60  ;;  %v878_v22 = vadd.f32 %v814_v58, %v677_v5  ;;  %v749_v58 = vld [vmem:[#allocation10 + $0x450] sm:$0xff] }
 0x359   :  { %v1466_v46 = vmul.f32 %v1402_v11, %v2667_v59  ;;  %v1329_v2 = vadd.f32 %v1265_v39, %v1128_v54  ;;  %v553_v29 = vld [vmem:[#allocation10 + $0x278] sm:$0xff]  ;;  %v1409_v6 = vmul.f32 %v1345_v62, %v2667_v59  ;;  %v408_v13 = vmul.f32 %v344_v63, %v2624_v4  ;;  %v540_v54 = vld [vmem:[#allocation10 + $0x210] sm:$0xff] }
 0x35a   :  { %v1522_v12 = vadd.f32 %v1458_v25, %v1321_v61  ;;  %v1353_v17 = vld [vmem:[#allocation10 + $0xa58] sm:$0xff]  ;;  %v1071_v24 = vadd.f32 %v1007_v7, %v870_v34  ;;  %v416_v11 = vmul.f32 %v352_v9, %v2624_v4  ;;  %v609_v15 = vmul.f32 %v545_v10, %v2641_v31  ;;  %v942_v7 = vld [vmem:[#allocation10 + $0x610] sm:$0xff] }
 0x35b   :  { %v746_v18 = vld [vmem:[#allocation10 + $0x438] sm:$0xff]  ;;  %v1530_v19 = vadd.f32 %v1466_v46, %v1329_v2  ;;  %v617_v26 = vmul.f32 %v553_v29, %v2641_v31  ;;  %v1079_v41 = vadd.f32 %v1015_v8, %v878_v22  ;;  %v1417_v35 = vmul.f32 %v1353_v17, %v2667_v59  ;;  %v339_v46 = vld [vmem:[#allocation10 + $0x10] sm:$0xff] }
 0x35c   :  { %v754_v23 = vld [vmem:[#allocation10 + $0x478] sm:$0xff]  ;;  %v810_v42 = vmul.f32 %v746_v18, %v2622_v3  ;;  %v1272_v20 = vadd.f32 %v1208_v14, %v1071_v24  ;;  %v673_v25 = vadd.f32 %v609_v15, %v408_v13  ;;  %v403_v2 = vmul.f32 %v339_v46, %v2624_v4  ;;  %v1143_v34 = vld [vmem:[#allocation10 + $0x810] sm:$0xff] }
 0x35d   :  { %v947_v32 = vld [vmem:[#allocation10 + $0x638] sm:$0xff]  ;;  %v2101_v39 = vpack.c.bf16 %v1530_v19, %v1522_v12  ;;  %v681_v36 = vadd.f32 %v617_v26, %v416_v11  ;;  %v818_v40 = vmul.f32 %v754_v23, %v2622_v3  ;;  %v1280_v49 = vadd.f32 %v1216_v16, %v1079_v41  ;;  %v950_v12 = vld [vmem:[#allocation10 + $0x650] sm:$0xff] }
 0x35e   :  { %v955_v33 = vld [vmem:[#allocation10 + $0x678] sm:$0xff]  ;;  %v1011_v53 = vmul.f32 %v947_v32, %v2639_v30  ;;  %v1473_v56 = vadd.f32 %v1409_v6, %v1272_v20  ;;  %v874_v57 = vadd.f32 %v810_v42, %v673_v25  ;;  %1652 = vmatmul.mubr.f32.vlgmr.msra.gmra.mrb[0].mxu1 %v2611_v50  ;;  %v411_v5 = vmul.f32 %v347_v47, %v2624_v4  ;;  %v1151_v14 = vld [vmem:[#allocation10 + $0x850] sm:$0xff] }
 0x35f   :  { %v1148_v38 = vld [vmem:[#allocation10 + $0x838] sm:$0xff]  ;;  %2102 = vmatpush1.bf16.xpose.msra.mxu0 %v2101_v39  ;;  %v1019_v48 = vmul.f32 %v955_v33, %v2639_v30  ;;  %v882_v43 = vadd.f32 %v818_v40, %v681_v36  ;;  %v1481_v62 = vadd.f32 %v1417_v35, %v1280_v49  ;;  %v604_v10 = vmul.f32 %v540_v54, %v2641_v31  ;;  %v343_v19 = vld [vmem:[#allocation10 + $0x30] sm:$0xff] }
 0x360   :  { %v1156_v45 = vld [vmem:[#allocation10 + $0x878] sm:$0xff]  ;;  %v1212_v37 = vmul.f32 %v1148_v38, %v2669_v60  ;;  %v1075_v8 = vadd.f32 %v1011_v53, %v874_v57  ;;  %v612_v29 = vmul.f32 %v548_v55, %v2641_v31  ;;  %v805_v17 = vmul.f32 %v741_v28, %v2622_v3  ;;  %v1344_v24 = vld [vmem:[#allocation10 + $0xa10] sm:$0xff] }
 0x361   :  { %v1349_v44 = vld [vmem:[#allocation10 + $0xa38] sm:$0xff]  ;;  %v1220_v61 = vmul.f32 %v1156_v45, %v2669_v60  ;;  %v1083_v9 = vadd.f32 %v1019_v48, %v882_v43  ;;  %v2071_v50 = vpack.c.bf16 %v1481_v62, %v1473_v56  ;;  %v813_v18 = vmul.f32 %v749_v58, %v2622_v3  ;;  %v351_v11 = vld [vmem:[#allocation10 + $0x70] sm:$0xff] }
 0x362   :  { %v1357_v27 = vld [vmem:[#allocation10 + $0xa78] sm:$0xff]  ;;  %v1413_v63 = vmul.f32 %v1349_v44, %v2667_v59  ;;  %v1276_v22 = vadd.f32 %v1212_v37, %v1075_v8  ;;  %v668_v13 = vadd.f32 %v604_v10, %v403_v2  ;;  %v676_v23 = vadd.f32 %v612_v29, %v411_v5  ;;  %v544_v15 = vld [vmem:[#allocation10 + $0x230] sm:$0xff] }
 0x363   :  { %v1421_v16 = vmul.f32 %v1357_v27, %v2667_v59  ;;  %v1284_v6 = vadd.f32 %v1220_v61, %v1083_v9  ;;  %2072 = vmatprep.subr.bf16.mxu1 %v2071_v50  ;;  %v1006_v26 = vmul.f32 %v942_v7, %v2639_v30  ;;  %v1014_v32 = vmul.f32 %v950_v12, %v2639_v30  ;;  %v552_v39 = vld [vmem:[#allocation10 + $0x270] sm:$0xff]  ;;  %v356_v7 = vld [vmem:[#allocation10 + $0x98] sm:$0xff] }
 0x364   :  { %v1207_v33 = vmul.f32 %v1143_v34, %v2669_v60  ;;  %v1215_v38 = vmul.f32 %v1151_v14, %v2669_v60  ;;  %v1477_v41 = vadd.f32 %v1413_v63, %v1276_v22  ;;  %v869_v42 = vadd.f32 %v805_v17, %v668_v13  ;;  %v1352_v20 = vld [vmem:[#allocation10 + $0xa50] sm:$0xff]  ;;  %v557_v8 = vld [vmem:[#allocation10 + $0x298] sm:$0xff] }
 0x365   :  { %v1485_v35 = vadd.f32 %v1421_v16, %v1284_v6  ;;  %v877_v45 = vadd.f32 %v813_v18, %v676_v23  ;;  %v745_v25 = vld [vmem:[#allocation10 + $0x430] sm:$0xff]  ;;  %v1408_v40 = vmul.f32 %v1344_v24, %v2667_v59  ;;  %v407_v44 = vmul.f32 %v343_v19, %v2624_v4  ;;  %v364_v34 = vld [vmem:[#allocation10 + $0xd8] sm:$0xff] }
 0x366   :  { %1792 = vmatmul.mubr.f32.vlgmr.msra.gmra.mrb[4].mxu0 %v2613_v51  ;;  %v753_v36 = vld [vmem:[#allocation10 + $0x470] sm:$0xff]  ;;  %v415_v46 = vmul.f32 %v351_v11, %v2624_v4  ;;  %v608_v47 = vmul.f32 %v544_v15, %v2641_v31  ;;  %v1070_v48 = vadd.f32 %v1006_v26, %v869_v42  ;;  %v616_v54 = vmul.f32 %v552_v39, %v2641_v31  ;;  %v565_v14 = vld [vmem:[#allocation10 + $0x2d8] sm:$0xff] }
 0x367   :  { %v946_v49 = vld [vmem:[#allocation10 + $0x630] sm:$0xff]  ;;  %v2103_v53 = vpack.c.bf16 %v1485_v35, %v1477_v41  ;;  %v1078_v37 = vadd.f32 %v1014_v32, %v877_v45  ;;  %v1416_v51 = vmul.f32 %v1352_v20, %v2667_v59  ;;  %v809_v61 = vmul.f32 %v745_v25, %v2622_v3  ;;  %v758_v19 = vld [vmem:[#allocation10 + $0x498] sm:$0xff] }
 0x368   :  { %v954_v55 = vld [vmem:[#allocation10 + $0x670] sm:$0xff]  ;;  %v672_v43 = vadd.f32 %v608_v47, %v407_v44  ;;  %v817_v27 = vmul.f32 %v753_v36, %v2622_v3  ;;  %v1271_v58 = vadd.f32 %v1207_v33, %v1070_v48  ;;  %v680_v63 = vadd.f32 %v616_v54, %v415_v46  ;;  %v766_v22 = vld [vmem:[#allocation10 + $0x4d8] sm:$0xff] }
 0x369   :  { %v1147_v56 = vld [vmem:[#allocation10 + $0x830] sm:$0xff]  ;;  %2104 = vmatprep.subr.bf16.mxu0 %v2103_v53  ;;  %v1279_v62 = vadd.f32 %v1215_v38, %v1078_v37  ;;  %v1010_v2 = vmul.f32 %v946_v49, %v2639_v30  ;;  %v1018_v10 = vmul.f32 %v954_v55, %v2639_v30  ;;  %v420_v23 = vmul.f32 %v356_v7, %v2624_v4  ;;  %v959_v11 = vld [vmem:[#allocation10 + $0x698] sm:$0xff] }
 0x36a   :  { %v1155_v57 = vld [vmem:[#allocation10 + $0x870] sm:$0xff]  ;;  %v873_v9 = vadd.f32 %v809_v61, %v672_v43  ;;  %v1211_v29 = vmul.f32 %v1147_v56, %v2669_v60  ;;  %v1472_v50 = vadd.f32 %v1408_v40, %v1271_v58  ;;  %v881_v17 = vadd.f32 %v817_v27, %v680_v63  ;;  %v967_v15 = vld [vmem:[#allocation10 + $0x6d8] sm:$0xff] }
 0x36b   :  { %v1348_v28 = vld [vmem:[#allocation10 + $0xa30] sm:$0xff]  ;;  %v1219_v12 = vmul.f32 %v1155_v57, %v2669_v60  ;;  %v1480_v16 = vadd.f32 %v1416_v51, %v1279_v62  ;;  %v621_v24 = vmul.f32 %v557_v8, %v2641_v31  ;;  %v428_v33 = vmul.f32 %v364_v34, %v2624_v4  ;;  %v1160_v39 = vld [vmem:[#allocation10 + $0x898] sm:$0xff] }
 0x36c   :  { %v1356_v5 = vld [vmem:[#allocation10 + $0xa70] sm:$0xff]  ;;  %v1412_v18 = vmul.f32 %v1348_v28, %v2667_v59  ;;  %v1074_v6 = vadd.f32 %v1010_v2, %v873_v9  ;;  %v1082_v32 = vadd.f32 %v1018_v10, %v881_v17  ;;  %v629_v38 = vmul.f32 %v565_v14, %v2641_v31  ;;  %v1168_v41 = vld [vmem:[#allocation10 + $0x8d8] sm:$0xff] }
 0x36d   :  { %v1420_v13 = vmul.f32 %v1356_v5, %v2667_v59  ;;  %v2073_v26 = vpack.c.bf16 %v1480_v16, %v1472_v50  ;;  %v685_v42 = vadd.f32 %v621_v24, %v420_v23  ;;  %v822_v45 = vmul.f32 %v758_v19, %v2622_v3  ;;  %v1361_v25 = vld [vmem:[#allocation10 + $0xa98] sm:$0xff] }
 0x36e   :  { %v1275_v35 = vadd.f32 %v1211_v29, %v1074_v6  ;;  %v830_v20 = vmul.f32 %v766_v22, %v2622_v3  ;;  %v360_v36 = vld [vmem:[#allocation10 + $0xb8] sm:$0xff]  ;;  %v1283_v40 = vadd.f32 %v1219_v12, %v1082_v32  ;;  %v693_v44 = vadd.f32 %v629_v38, %v428_v33  ;;  %v355_v22 = vld [vmem:[#allocation10 + $0x90] sm:$0xff] }
 0x36f   :  { %2074 = vmatpush1.bf16.xpose.msra.mxu1 %v2073_v26  ;;  %v1023_v46 = vmul.f32 %v959_v11, %v2639_v30  ;;  %v1031_v47 = vmul.f32 %v967_v15, %v2639_v30  ;;  %v368_v49 = vld [vmem:[#allocation10 + $0xf8] sm:$0xff]  ;;  %v886_v54 = vadd.f32 %v822_v45, %v685_v42  ;;  %v1224_v55 = vmul.f32 %v1160_v39, %v2669_v60  ;;  %v363_v6 = vld [vmem:[#allocation10 + $0xd0] sm:$0xff] }
 0x370   :  { %v561_v53 = vld [vmem:[#allocation10 + $0x2b8] sm:$0xff]  ;;  %v1476_v37 = vadd.f32 %v1412_v18, %v1275_v35  ;;  %v1232_v56 = vmul.f32 %v1168_v41, %v2669_v60  ;;  %v1484_v43 = vadd.f32 %v1420_v13, %v1283_v40  ;;  %v894_v61 = vadd.f32 %v830_v20, %v693_v44  ;;  %v556_v15 = vld [vmem:[#allocation10 + $0x290] sm:$0xff] }
 0x371   :  { %v569_v48 = vld [vmem:[#allocation10 + $0x2f8] sm:$0xff]  ;;  %v1425_v27 = vmul.f32 %v1361_v25, %v2667_v59  ;;  %v424_v28 = vmul.f32 %v360_v36, %v2624_v4  ;;  %v1087_v62 = vadd.f32 %v1023_v46, %v886_v54  ;;  %v432_v63 = vmul.f32 %v368_v49, %v2624_v4  ;;  %v564_v26 = vld [vmem:[#allocation10 + $0x2d0] sm:$0xff] }
 0x372   :  { %v1369_v57 = vld [vmem:[#allocation10 + $0xad8] sm:$0xff]  ;;  %v625_v2 = vmul.f32 %v561_v53, %v2641_v31  ;;  %v633_v5 = vmul.f32 %v569_v48, %v2641_v31  ;;  %v2105_v10 = vpack.c.bf16 %v1484_v43, %v1476_v37  ;;  %v1095_v29 = vadd.f32 %v1031_v47, %v894_v61  ;;  %v757_v35 = vld [vmem:[#allocation10 + $0x490] sm:$0xff] }
 0x373   :  { %v762_v51 = vld [vmem:[#allocation10 + $0x4b8] sm:$0xff]  ;;  %v1433_v12 = vmul.f32 %v1369_v57, %v2667_v59  ;;  %v1288_v50 = vadd.f32 %v1224_v55, %v1087_v62  ;;  %v765_v42 = vld [vmem:[#allocation10 + $0x4d0] sm:$0xff]  ;;  %v419_v25 = vmul.f32 %v355_v22, %v2624_v4  ;;  %v427_v36 = vmul.f32 %v363_v6, %v2624_v4 }
 0x374   :  { %v770_v58 = vld [vmem:[#allocation10 + $0x4f8] sm:$0xff]  ;;  %v826_v34 = vmul.f32 %v762_v51, %v2622_v3  ;;  %v689_v16 = vadd.f32 %v625_v2, %v424_v28  ;;  %v697_v17 = vadd.f32 %v633_v5, %v432_v63  ;;  %2106 = vmatpush1.bf16.xpose.msra.mxu0 %v2105_v10  ;;  %v1296_v13 = vadd.f32 %v1232_v56, %v1095_v29  ;;  %v958_v40 = vld [vmem:[#allocation10 + $0x690] sm:$0xff] }
 0x375   :  { %v963_v7 = vld [vmem:[#allocation10 + $0x6b8] sm:$0xff]  ;;  %v834_v18 = vmul.f32 %v770_v58, %v2622_v3  ;;  %v1489_v32 = vadd.f32 %v1425_v27, %v1288_v50  ;;  %v620_v47 = vmul.f32 %v556_v15, %v2641_v31  ;;  %v628_v49 = vmul.f32 %v564_v26, %v2641_v31  ;;  %v966_v53 = vld [vmem:[#allocation10 + $0x6d0] sm:$0xff] }
 0x376   :  { %v971_v8 = vld [vmem:[#allocation10 + $0x6f8] sm:$0xff]  ;;  %v1027_v23 = vmul.f32 %v963_v7, %v2639_v30  ;;  %v890_v33 = vadd.f32 %v826_v34, %v689_v16  ;;  %v1497_v45 = vadd.f32 %v1433_v12, %v1296_v13  ;;  %v1159_v48 = vld [vmem:[#allocation10 + $0x890] sm:$0xff]  ;;  %v821_v56 = vmul.f32 %v757_v35, %v2622_v3 }
 0x377   :  { %v1164_v9 = vld [vmem:[#allocation10 + $0x8b8] sm:$0xff]  ;;  %v1035_v24 = vmul.f32 %v971_v8, %v2639_v30  ;;  %v898_v38 = vadd.f32 %v834_v18, %v697_v17  ;;  %v1167_v37 = vld [vmem:[#allocation10 + $0x8d0] sm:$0xff]  ;;  %v829_v57 = vmul.f32 %v765_v42, %v2622_v3  ;;  %v684_v27 = vadd.f32 %v620_v47, %v419_v25 }
 0x378   :  { %v1172_v14 = vld [vmem:[#allocation10 + $0x8f8] sm:$0xff]  ;;  %v1228_v11 = vmul.f32 %v1164_v9, %v2669_v60  ;;  %v1091_v44 = vadd.f32 %v1027_v23, %v890_v33  ;;  %v2075_v54 = vpack.c.bf16 %v1497_v45, %v1489_v32  ;;  %v359_v51 = vld [vmem:[#allocation10 + $0xb0] sm:$0xff]  ;;  %v692_v28 = vadd.f32 %v628_v49, %v427_v36 }
 0x379   :  { %v1365_v19 = vld [vmem:[#allocation10 + $0xab8] sm:$0xff]  ;;  %v1236_v39 = vmul.f32 %v1172_v14, %v2669_v60  ;;  %v1099_v46 = vadd.f32 %v1035_v24, %v898_v38  ;;  %v1360_v58 = vld [vmem:[#allocation10 + $0xa90] sm:$0xff]  ;;  %v1022_v2 = vmul.f32 %v958_v40, %v2639_v30  ;;  %v1030_v5 = vmul.f32 %v966_v53, %v2639_v30 }
 0x37a   :  { %v1373_v41 = vld [vmem:[#allocation10 + $0xaf8] sm:$0xff]  ;;  %v1429_v20 = vmul.f32 %v1365_v19, %v2667_v59  ;;  %v1292_v43 = vadd.f32 %v1228_v11, %v1091_v44  ;;  %v367_v62 = vld [vmem:[#allocation10 + $0xf0] sm:$0xff]  ;;  %2076 = vmatprep.subr.bf16.mxu1 %v2075_v54  ;;  %v1223_v7 = vmul.f32 %v1159_v48, %v2669_v60  ;;  %v1231_v8 = vmul.f32 %v1167_v37, %v2669_v60 }
 0x37b   :  { %v1437_v55 = vmul.f32 %v1373_v41, %v2667_v59  ;;  %v1300_v61 = vadd.f32 %v1236_v39, %v1099_v46  ;;  %v560_v63 = vld [vmem:[#allocation10 + $0x2b0] sm:$0xff]  ;;  %v885_v12 = vadd.f32 %v821_v56, %v684_v27  ;;  %v893_v34 = vadd.f32 %v829_v57, %v692_v28  ;;  %v372_v40 = vld [vmem:[#allocation10 + $0x118] sm:$0xff] }
 0x37c   :  { %v568_v9 = vld [vmem:[#allocation10 + $0x2f0] sm:$0xff]  ;;  %v1493_v10 = vadd.f32 %v1429_v20, %v1292_v43  ;;  %v1424_v17 = vmul.f32 %v1360_v58, %v2667_v59  ;;  %v423_v18 = vmul.f32 %v359_v51, %v2624_v4  ;;  %v431_v19 = vmul.f32 %v367_v62, %v2624_v4  ;;  %v573_v44 = vld [vmem:[#allocation10 + $0x318] sm:$0xff] }
 0x37d   :  { %v1501_v29 = vadd.f32 %v1437_v55, %v1300_v61  ;;  %v1368_v14 = vld [vmem:[#allocation10 + $0xad0] sm:$0xff]  ;;  %v624_v22 = vmul.f32 %v560_v63, %v2641_v31  ;;  %v1086_v23 = vadd.f32 %v1022_v2, %v885_v12  ;;  %v1094_v24 = vadd.f32 %v1030_v5, %v893_v34  ;;  %v380_v48 = vld [vmem:[#allocation10 + $0x158] sm:$0xff] }
 0x37e   :  { %v761_v50 = vld [vmem:[#allocation10 + $0x4b0] sm:$0xff]  ;;  %v632_v11 = vmul.f32 %v568_v9, %v2641_v31  ;;  %v1432_v33 = vmul.f32 %v1368_v14, %v2667_v59  ;;  %v581_v37 = vld [vmem:[#allocation10 + $0x358] sm:$0xff]  ;;  %v436_v28 = vmul.f32 %v372_v40, %v2624_v4  ;;  %v637_v58 = vmul.f32 %v573_v44, %v2641_v31 }
 0x37f   :  { %v769_v16 = vld [vmem:[#allocation10 + $0x4f0] sm:$0xff]  ;;  %v2107_v13 = vpack.c.bf16 %v1501_v29, %v1493_v10  ;;  %v688_v38 = vadd.f32 %v624_v22, %v423_v18  ;;  %v825_v39 = vmul.f32 %v761_v50, %v2622_v3  ;;  %v1287_v42 = vadd.f32 %v1223_v7, %v1086_v23  ;;  %v774_v51 = vld [vmem:[#allocation10 + $0x518] sm:$0xff] }
 0x380   :  { %v962_v6 = vld [vmem:[#allocation10 + $0x6b0] sm:$0xff]  ;;  %v833_v41 = vmul.f32 %v769_v16, %v2622_v3  ;;  %v1295_v45 = vadd.f32 %v1231_v8, %v1094_v24  ;;  %v696_v20 = vadd.f32 %v632_v11, %v431_v19  ;;  %v782_v43 = vld [vmem:[#allocation10 + $0x558] sm:$0xff]  ;;  %v444_v7 = vmul.f32 %v380_v48, %v2624_v4 }
 0x381   :  { %v970_v15 = vld [vmem:[#allocation10 + $0x6f0] sm:$0xff]  ;;  %2108 = vmatprep.subr.bf16.mxu0 %v2107_v13  ;;  %v1026_v25 = vmul.f32 %v962_v6, %v2639_v30  ;;  %v889_v46 = vadd.f32 %v825_v39, %v688_v38  ;;  %v1488_v54 = vadd.f32 %v1424_v17, %v1287_v42  ;;  %v975_v62 = vld [vmem:[#allocation10 + $0x718] sm:$0xff]  ;;  %v645_v8 = vmul.f32 %v581_v37, %v2641_v31 }
 0x382   :  { %v1163_v26 = vld [vmem:[#allocation10 + $0x8b0] sm:$0xff]  ;;  %v1034_v47 = vmul.f32 %v970_v15, %v2639_v30  ;;  %v1496_v55 = vadd.f32 %v1432_v33, %v1295_v45  ;;  %v897_v56 = vadd.f32 %v833_v41, %v696_v20  ;;  %v983_v63 = vld [vmem:[#allocation10 + $0x758] sm:$0xff]  ;;  %v701_v12 = vadd.f32 %v637_v58, %v436_v28 }
 0x383   :  { %v1171_v32 = vld [vmem:[#allocation10 + $0x8f0] sm:$0xff]  ;;  %v1227_v49 = vmul.f32 %v1163_v26, %v2669_v60  ;;  %v1090_v61 = vadd.f32 %v1026_v25, %v889_v46  ;;  %v1176_v9 = vld [vmem:[#allocation10 + $0x918] sm:$0xff]  ;;  %v838_v34 = vmul.f32 %v774_v51, %v2622_v3  ;;  %v846_v14 = vmul.f32 %v782_v43, %v2622_v3 }
 0x384   :  { %v1364_v35 = vld [vmem:[#allocation10 + $0xab0] sm:$0xff]  ;;  %v1235_v53 = vmul.f32 %v1171_v32, %v2669_v60  ;;  %v2077_v2 = vpack.c.bf16 %v1496_v55, %v1488_v54  ;;  %v1098_v5 = vadd.f32 %v1034_v47, %v897_v56  ;;  %v1184_v10 = vld [vmem:[#allocation10 + $0x958] sm:$0xff]  ;;  %v709_v18 = vadd.f32 %v645_v8, %v444_v7 }
 0x385   :  { %v1372_v36 = vld [vmem:[#allocation10 + $0xaf0] sm:$0xff]  ;;  %v1428_v57 = vmul.f32 %v1364_v35, %v2667_v59  ;;  %v1291_v29 = vadd.f32 %v1227_v49, %v1090_v61  ;;  %v1377_v50 = vld [vmem:[#allocation10 + $0xb18] sm:$0xff]  ;;  %v1039_v19 = vmul.f32 %v975_v62, %v2639_v30  ;;  %v1047_v22 = vmul.f32 %v983_v63, %v2639_v30 }
 0x386   :  { %v1436_v27 = vmul.f32 %v1372_v36, %v2667_v59  ;;  %v376_v16 = vld [vmem:[#allocation10 + $0x138] sm:$0xff]  ;;  %2078 = vmatpush1.bf16.xpose.msra.mxu1 %v2077_v2  ;;  %v1299_v17 = vadd.f32 %v1235_v53, %v1098_v5  ;;  %v902_v11 = vadd.f32 %v838_v34, %v701_v12  ;;  %v1240_v15 = vmul.f32 %v1176_v9, %v2669_v60  ;;  %v371_v43 = vld [vmem:[#allocation10 + $0x110] sm:$0xff] }
 0x387   :  { %v384_v6 = vld [vmem:[#allocation10 + $0x178] sm:$0xff]  ;;  %v1492_v24 = vadd.f32 %v1428_v57, %v1291_v29  ;;  %v1248_v26 = vmul.f32 %v1184_v10, %v2669_v60  ;;  %v910_v39 = vadd.f32 %v846_v14, %v709_v18  ;;  %v1441_v41 = vmul.f32 %v1377_v50, %v2667_v59  ;;  %v379_v61 = vld [vmem:[#allocation10 + $0x150] sm:$0xff] }
 0x388   :  { %v577_v13 = vld [vmem:[#allocation10 + $0x338] sm:$0xff]  ;;  %v1500_v38 = vadd.f32 %v1436_v27, %v1299_v17  ;;  %v440_v35 = vmul.f32 %v376_v16, %v2624_v4  ;;  %v1103_v45 = vadd.f32 %v1039_v19, %v902_v11  ;;  %v448_v20 = vmul.f32 %v384_v6, %v2624_v4  ;;  %v572_v63 = vld [vmem:[#allocation10 + $0x310] sm:$0xff] }
 0x389   :  { %v585_v23 = vld [vmem:[#allocation10 + $0x378] sm:$0xff]  ;;  %v641_v25 = vmul.f32 %v577_v13, %v2641_v31  ;;  %v1111_v49 = vadd.f32 %v1047_v22, %v910_v39  ;;  %v580_v2 = vld [vmem:[#allocation10 + $0x350] sm:$0xff]  ;;  %v435_v50 = vmul.f32 %v371_v43, %v2624_v4  ;;  %v443_v16 = vmul.f32 %v379_v61, %v2624_v4 }
 0x38a   :  { %v1385_v32 = vld [vmem:[#allocation10 + $0xb58] sm:$0xff]  ;;  %v649_v36 = vmul.f32 %v585_v23, %v2641_v31  ;;  %v2109_v47 = vpack.c.bf16 %v1500_v38, %v1492_v24  ;;  %v1304_v54 = vadd.f32 %v1240_v15, %v1103_v45  ;;  %v773_v29 = vld [vmem:[#allocation10 + $0x510] sm:$0xff]  ;;  %v636_v22 = vmul.f32 %v572_v63, %v2641_v31 }
 0x38b   :  { %v778_v33 = vld [vmem:[#allocation10 + $0x538] sm:$0xff]  ;;  %v1449_v53 = vmul.f32 %v1385_v32, %v2667_v59  ;;  %v705_v55 = vadd.f32 %v641_v25, %v440_v35  ;;  %v1312_v27 = vadd.f32 %v1248_v26, %v1111_v49  ;;  %v781_v12 = vld [vmem:[#allocation10 + $0x550] sm:$0xff]  ;;  %v644_v6 = vmul.f32 %v580_v2, %v2641_v31 }
 0x38c   :  { %v786_v42 = vld [vmem:[#allocation10 + $0x578] sm:$0xff]  ;;  %v842_v48 = vmul.f32 %v778_v33, %v2622_v3  ;;  %v713_v56 = vadd.f32 %v649_v36, %v448_v20  ;;  %2110 = vmatpush1.bf16.xpose.msra.mxu0 %v2109_v47  ;;  %v1505_v5 = vadd.f32 %v1441_v41, %v1304_v54  ;;  %v974_v17 = vld [vmem:[#allocation10 + $0x710] sm:$0xff]  ;;  %v837_v26 = vmul.f32 %v773_v29, %v2622_v3 }
 0x38d   :  { %v979_v40 = vld [vmem:[#allocation10 + $0x738] sm:$0xff]  ;;  %v850_v57 = vmul.f32 %v786_v42, %v2622_v3  ;;  %v1513_v34 = vadd.f32 %v1449_v53, %v1312_v27  ;;  %v982_v13 = vld [vmem:[#allocation10 + $0x750] sm:$0xff]  ;;  %v845_v32 = vmul.f32 %v781_v12, %v2622_v3  ;;  %v700_v41 = vadd.f32 %v636_v22, %v435_v50 }
 0x38e   :  { %v987_v44 = vld [vmem:[#allocation10 + $0x778] sm:$0xff]  ;;  %v1043_v28 = vmul.f32 %v979_v40, %v2639_v30  ;;  %v906_v7 = vadd.f32 %v842_v48, %v705_v55  ;;  %v1175_v23 = vld [vmem:[#allocation10 + $0x910] sm:$0xff]  ;;  %v708_v35 = vadd.f32 %v644_v6, %v443_v16  ;;  %v1038_v25 = vmul.f32 %v974_v17, %v2639_v30 }
 0x38f   :  { %v1180_v46 = vld [vmem:[#allocation10 + $0x938] sm:$0xff]  ;;  %v1051_v58 = vmul.f32 %v987_v44, %v2639_v30  ;;  %v914_v8 = vadd.f32 %v850_v57, %v713_v56  ;;  %v1183_v24 = vld [vmem:[#allocation10 + $0x950] sm:$0xff]  ;;  %v2079_v11 = vpack.c.bf16 %v1513_v34, %v1505_v5  ;;  %v1046_v36 = vmul.f32 %v982_v13, %v2639_v30 }
 0x390   :  { %v1188_v37 = vld [vmem:[#allocation10 + $0x978] sm:$0xff]  ;;  %v1244_v62 = vmul.f32 %v1180_v46, %v2669_v60  ;;  %v1107_v18 = vadd.f32 %v1043_v28, %v906_v7  ;;  %v375_v33 = vld [vmem:[#allocation10 + $0x130] sm:$0xff]  ;;  %v1239_v40 = vmul.f32 %v1175_v23, %v2669_v60  ;;  %v1247_v44 = vmul.f32 %v1183_v24, %v2669_v60 }
 0x391   :  { %v1381_v51 = vld [vmem:[#allocation10 + $0xb38] sm:$0xff]  ;;  %v1252_v9 = vmul.f32 %v1188_v37, %v2669_v60  ;;  %v1115_v19 = vadd.f32 %v1051_v58, %v914_v8  ;;  %v1376_v42 = vld [vmem:[#allocation10 + $0xb10] sm:$0xff]  ;;  %2080 = vmatprep.subr.bf16.mxu1 %v2079_v11  ;;  %v901_v53 = vadd.f32 %v837_v26, %v700_v41  ;;  %v909_v48 = vadd.f32 %v845_v32, %v708_v35 }
 0x392   :  { %v1389_v10 = vld [vmem:[#allocation10 + $0xb78] sm:$0xff]  ;;  %v1445_v14 = vmul.f32 %v1381_v51, %v2667_v59  ;;  %v1308_v38 = vadd.f32 %v1244_v62, %v1107_v18  ;;  %v383_v45 = vld [vmem:[#allocation10 + $0x170] sm:$0xff]  ;;  %v1440_v56 = vmul.f32 %v1376_v42, %v2667_v59  ;;  %v439_v57 = vmul.f32 %v375_v33, %v2624_v4 }
 0x393   :  { %v1453_v15 = vmul.f32 %v1389_v10, %v2667_v59  ;;  %v1316_v39 = vadd.f32 %v1252_v9, %v1115_v19  ;;  %v576_v20 = vld [vmem:[#allocation10 + $0x330] sm:$0xff]  ;;  %v447_v51 = vmul.f32 %v383_v45, %v2624_v4  ;;  %v1102_v28 = vadd.f32 %v1038_v25, %v901_v53  ;;  %v388_v17 = vld [vmem:[#allocation10 + $0x198] sm:$0xff] }
 0x394   :  { %v584_v46 = vld [vmem:[#allocation10 + $0x370] sm:$0xff]  ;;  %v1509_v47 = vadd.f32 %v1445_v14, %v1308_v38  ;;  %v640_v43 = vmul.f32 %v576_v20, %v2641_v31  ;;  %v1110_v58 = vadd.f32 %v1046_v36, %v909_v48  ;;  %v589_v18 = vld [vmem:[#allocation10 + $0x398] sm:$0xff]  ;;  %v452_v35 = vmul.f32 %v388_v17, %v2624_v4 }
 0x395   :  { %v1517_v49 = vadd.f32 %v1453_v15, %v1316_v39  ;;  %v1384_v37 = vld [vmem:[#allocation10 + $0xb50] sm:$0xff]  ;;  %v648_v62 = vmul.f32 %v584_v46, %v2641_v31  ;;  %v1303_v12 = vadd.f32 %v1239_v40, %v1102_v28  ;;  %v396_v23 = vld [vmem:[#allocation10 + $0x1d8] sm:$0xff]  ;;  %v653_v42 = vmul.f32 %v589_v18, %v2641_v31 }
 0x396   :  { %v777_v54 = vld [vmem:[#allocation10 + $0x530] sm:$0xff]  ;;  %v1448_v7 = vmul.f32 %v1384_v37, %v2667_v59  ;;  %v704_v8 = vadd.f32 %v640_v43, %v439_v57  ;;  %v1311_v34 = vadd.f32 %v1247_v44, %v1110_v58  ;;  %v597_v24 = vld [vmem:[#allocation10 + $0x3d8] sm:$0xff]  ;;  %v460_v40 = vmul.f32 %v396_v23, %v2624_v4 }
 0x397   :  { %v785_v55 = vld [vmem:[#allocation10 + $0x570] sm:$0xff]  ;;  %v2111_v27 = vpack.c.bf16 %v1517_v49, %v1509_v47  ;;  %v841_v9 = vmul.f32 %v777_v54, %v2622_v3  ;;  %v712_v14 = vadd.f32 %v648_v62, %v447_v51  ;;  %v1504_v11 = vadd.f32 %v1440_v56, %v1303_v12  ;;  %v790_v33 = vld [vmem:[#allocation10 + $0x598] sm:$0xff] }
 0x398   :  { %v978_v61 = vld [vmem:[#allocation10 + $0x730] sm:$0xff]  ;;  %v849_v10 = vmul.f32 %v785_v55, %v2622_v3  ;;  %v1512_v15 = vadd.f32 %v1448_v7, %v1311_v34  ;;  %v798_v38 = vld [vmem:[#allocation10 + $0x5d8] sm:$0xff]  ;;  %v661_v44 = vmul.f32 %v597_v24, %v2641_v31  ;;  %v717_v53 = vadd.f32 %v653_v42, %v452_v35 }
 0x399   :  { %v986_v63 = vld [vmem:[#allocation10 + $0x770] sm:$0xff]  ;;  %2112 = vmatprep.subr.bf16.mxu0 %v2111_v27  ;;  %v1042_v50 = vmul.f32 %v978_v61, %v2639_v30  ;;  %v905_v19 = vadd.f32 %v841_v9, %v704_v8  ;;  %v991_v45 = vld [vmem:[#allocation10 + $0x798] sm:$0xff]  ;;  %v854_v48 = vmul.f32 %v790_v33, %v2622_v3  ;;  %v862_v37 = vmul.f32 %v798_v38, %v2622_v3 }
 0x39a   :  { %v1179_v2 = vld [vmem:[#allocation10 + $0x930] sm:$0xff]  ;;  %v1050_v22 = vmul.f32 %v986_v63, %v2639_v30  ;;  %v913_v26 = vadd.f32 %v849_v10, %v712_v14  ;;  %v999_v20 = vld [vmem:[#allocation10 + $0x7d8] sm:$0xff]  ;;  %v2081_v25 = vpack.c.bf16 %v1512_v15, %v1504_v11  ;;  %v725_v57 = vadd.f32 %v661_v44, %v460_v40 }
 0x39b   :  { %v1187_v5 = vld [vmem:[#allocation10 + $0x970] sm:$0xff]  ;;  %v1243_v6 = vmul.f32 %v1179_v2, %v2669_v60  ;;  %v1106_v39 = vadd.f32 %v1042_v50, %v905_v19  ;;  %v1192_v46 = vld [vmem:[#allocation10 + $0x998] sm:$0xff]  ;;  %v1055_v51 = vmul.f32 %v991_v45, %v2639_v30  ;;  %v1063_v43 = vmul.f32 %v999_v20, %v2639_v30 }
 0x39c   :  { %v1380_v29 = vld [vmem:[#allocation10 + $0xb30] sm:$0xff]  ;;  %v1251_v13 = vmul.f32 %v1187_v5, %v2669_v60  ;;  %v1114_v36 = vadd.f32 %v1050_v22, %v913_v26  ;;  %v1200_v47 = vld [vmem:[#allocation10 + $0x9d8] sm:$0xff]  ;;  %2082 = vmatpush1.bf16.xpose.msra.mxu1 %v2081_v25  ;;  %v918_v62 = vadd.f32 %v854_v48, %v717_v53  ;;  %v1256_v63 = vmul.f32 %v1192_v46, %v2669_v60 }
 0x39d   :  { %v1388_v16 = vld [vmem:[#allocation10 + $0xb70] sm:$0xff]  ;;  %v1444_v32 = vmul.f32 %v1380_v29, %v2667_v59  ;;  %v1307_v49 = vadd.f32 %v1243_v6, %v1106_v39  ;;  %v1393_v54 = vld [vmem:[#allocation10 + $0xb98] sm:$0xff]  ;;  %v1264_v2 = vmul.f32 %v1200_v47, %v2669_v60  ;;  %v926_v9 = vadd.f32 %v862_v37, %v725_v57 }
 0x39e   :  { %v1452_v41 = vmul.f32 %v1388_v16, %v2667_v59  ;;  %v392_v55 = vld [vmem:[#allocation10 + $0x1b8] sm:$0xff]  ;;  %v1315_v56 = vadd.f32 %v1251_v13, %v1114_v36  ;;  %v1457_v10 = vmul.f32 %v1393_v54, %v2667_v59  ;;  %v1119_v34 = vadd.f32 %v1055_v51, %v918_v62  ;;  %v387_v38 = vld [vmem:[#allocation10 + $0x190] sm:$0xff] }
 0x39f   :  { %v400_v61 = vld [vmem:[#allocation10 + $0x1f8] sm:$0xff]  ;;  %v1508_v58 = vadd.f32 %v1444_v32, %v1307_v49  ;;  %v456_v29 = vmul.f32 %v392_v55, %v2624_v4  ;;  %v1127_v6 = vadd.f32 %v1063_v43, %v926_v9  ;;  %v395_v39 = vld [vmem:[#allocation10 + $0x1d0] sm:$0xff]  ;;  %v451_v54 = vmul.f32 %v387_v38, %v2624_v4 }
 0x3a0   :  { %v593_v27 = vld [vmem:[#allocation10 + $0x3b8] sm:$0xff]  ;;  %v1516_v8 = vadd.f32 %v1452_v41, %v1315_v56  ;;  %v464_v14 = vmul.f32 %v400_v61, %v2624_v4  ;;  %v1320_v11 = vadd.f32 %v1256_v63, %v1119_v34  ;;  %v588_v20 = vld [vmem:[#allocation10 + $0x390] sm:$0xff]  ;;  %v459_v55 = vmul.f32 %v395_v39, %v2624_v4 }
 0x3a1   :  { %v601_v28 = vld [vmem:[#allocation10 + $0x3f8] sm:$0xff]  ;;  %v657_v50 = vmul.f32 %v593_v27, %v2641_v31  ;;  %v1328_v41 = vadd.f32 %v1264_v2, %v1127_v6  ;;  %v596_v25 = vld [vmem:[#allocation10 + $0x3d0] sm:$0xff]  ;;  %v652_v51 = vmul.f32 %v588_v20, %v2641_v31 }
 0x3a2   :  { %v1401_v5 = vld [vmem:[#allocation10 + $0xbd8] sm:$0xff]  ;;  %v665_v16 = vmul.f32 %v601_v28, %v2641_v31  ;;  %v2113_v22 = vpack.c.bf16 %v1516_v8, %v1508_v58  ;;  %v1521_v36 = vadd.f32 %v1457_v10, %v1320_v11  ;;  %v789_v49 = vld [vmem:[#allocation10 + $0x590] sm:$0xff]  ;;  %v660_v43 = vmul.f32 %v596_v25, %v2641_v31 }
 0x3a3   :  { %v794_v7 = vld [vmem:[#allocation10 + $0x5b8] sm:$0xff]  ;;  %v1465_v13 = vmul.f32 %v1401_v5, %v2667_v59  ;;  %v721_v15 = vadd.f32 %v657_v50, %v456_v29  ;;  %v797_v53 = vld [vmem:[#allocation10 + $0x5d0] sm:$0xff]  ;;  %v853_v63 = vmul.f32 %v789_v49, %v2622_v3  ;;  %v716_v9 = vadd.f32 %v652_v51, %v451_v54 }
 0x3a4   :  { %v802_v12 = vld [vmem:[#allocation10 + $0x5f8] sm:$0xff]  ;;  %v858_v23 = vmul.f32 %v794_v7, %v2622_v3  ;;  %v729_v26 = vadd.f32 %v665_v16, %v464_v14  ;;  %2114 = vmatpush1.bf16.xpose.msra.mxu0 %v2113_v22  ;;  %v990_v61 = vld [vmem:[#allocation10 + $0x790] sm:$0xff]  ;;  %v861_v2 = vmul.f32 %v797_v53, %v2622_v3  ;;  %v724_v10 = vadd.f32 %v660_v43, %v459_v55  ;;  %v2157_v14 = vld [vmem:[#allocation13] sm:$0xff] }
 0x3a5   :  { %v995_v17 = vld [vmem:[#allocation10 + $0x7b8] sm:$0xff]  ;;  %v866_v32 = vmul.f32 %v802_v12, %v2622_v3  ;;  %v1529_v48 = vadd.f32 %v1465_v13, %v1328_v41  ;;  %v998_v27 = vld [vmem:[#allocation10 + $0x7d0] sm:$0xff]  ;;  %v1545_v50 = vcombine.high %v2157_v14, %v2157_v14  ;;  %v1054_v16 = vmul.f32 %v990_v61, %v2639_v30 }
 0x3a6   :  { %v1003_v18 = vld [vmem:[#allocation10 + $0x7f8] sm:$0xff]  ;;  %v1059_v35 = vmul.f32 %v995_v17, %v2639_v30  ;;  %v922_v40 = vadd.f32 %v858_v23, %v721_v15  ;;  %v1191_v28 = vld [vmem:[#allocation10 + $0x990] sm:$0xff]  ;;  %v1062_v17 = vmul.f32 %v998_v27, %v2639_v30  ;;  %v917_v13 = vadd.f32 %v853_v63, %v716_v9 }
 0x3a7   :  { %v1196_v19 = vld [vmem:[#allocation10 + $0x9b8] sm:$0xff]  ;;  %v1067_v42 = vmul.f32 %v1003_v18, %v2639_v30  ;;  %v930_v44 = vadd.f32 %v866_v32, %v729_v26  ;;  %v2083_v58 = vpack.c.bf16 %v1529_v48, %v1521_v36  ;;  %v391_v5 = vld [vmem:[#allocation10 + $0x1b0] sm:$0xff]  ;;  %v1255_v18 = vmul.f32 %v1191_v28, %v2669_v60 }
 0x3a8   :  { %v1204_v24 = vld [vmem:[#allocation10 + $0x9f8] sm:$0xff]  ;;  %v1260_v45 = vmul.f32 %v1196_v19, %v2669_v60  ;;  %v1123_v56 = vadd.f32 %v1059_v35, %v922_v40  ;;  %v1199_v29 = vld [vmem:[#allocation10 + $0x9d0] sm:$0xff]  ;;  %v925_v23 = vadd.f32 %v861_v2, %v724_v10  ;;  %v455_v32 = vmul.f32 %v391_v5, %v2624_v4 }
 0x3a9   :  { %v1397_v33 = vld [vmem:[#allocation10 + $0xbb8] sm:$0xff]  ;;  %v1268_v46 = vmul.f32 %v1204_v24, %v2669_v60  ;;  %v1131_v57 = vadd.f32 %v1067_v42, %v930_v44  ;;  %v399_v12 = vld [vmem:[#allocation10 + $0x1f0] sm:$0xff]  ;;  %2084 = vmatprep.subr.bf16.mxu1 %v2083_v58  ;;  %v1263_v26 = vmul.f32 %v1199_v29, %v2669_v60  ;;  %v1118_v35 = vadd.f32 %v1054_v16, %v917_v13 }
 0x3aa   :  { %v1405_v47 = vld [vmem:[#allocation10 + $0xbf8] sm:$0xff]  ;;  %v1461_v37 = vmul.f32 %v1397_v33, %v2667_v59  ;;  %v1324_v7 = vadd.f32 %v1260_v45, %v1123_v56  ;;  %v592_v34 = vld [vmem:[#allocation10 + $0x3b0] sm:$0xff]  ;;  %v463_v33 = vmul.f32 %v399_v12, %v2624_v4  ;;  %v1126_v42 = vadd.f32 %v1062_v17, %v925_v23  ;;  %v1870_v23 = vld [vmem:[#allocation14 + $0x10] sm:$0xff] }
 0x3ab   :  { %v1469_v62 = vmul.f32 %v1405_v47, %v2667_v59  ;;  %v1332_v8 = vadd.f32 %v1268_v46, %v1131_v57  ;;  %v600_v19 = vld [vmem:[#allocation10 + $0x3f0] sm:$0xff]  ;;  %v656_v38 = vmul.f32 %v592_v34, %v2641_v31  ;;  %v1319_v47 = vadd.f32 %v1255_v18, %v1118_v35 }
 0x3ac   :  { %v1525_v22 = vadd.f32 %v1461_v37, %v1324_v7  ;;  %v1392_v24 = vld [vmem:[#allocation10 + $0xb90] sm:$0xff]  ;;  %v664_v45 = vmul.f32 %v600_v19, %v2641_v31  ;;  %v1327_v49 = vadd.f32 %v1263_v26, %v1126_v42  ;;  %v1559_v63 = vrot.slane %v1545_v50, %v2616_v52  ;;  %v1868_v50 = vld [vmem:[#allocation14] sm:$0xff]  ;;  %v1869_v19 = vld [vmem:[#allocation14 + $0x8] sm:$0xff] }
 0x3ad   :  { %v1533_v6 = vadd.f32 %v1469_v62, %v1332_v8  ;;  %v1400_v11 = vld [vmem:[#allocation10 + $0xbd0] sm:$0xff]  ;;  %v1456_v25 = vmul.f32 %v1392_v24, %v2667_v59  ;;  %v720_v40 = vadd.f32 %v656_v38, %v455_v32  ;;  %v2120_v13 = vpack.c.bf16 %v1869_v19, %v1868_v50  ;;  %v1874_v26 = vld [vmem:[#allocation14 + $0x30] sm:$0xff]  ;;  %v931_v42 = vld [vmem:[#allocation11 + $0x2] sm:$0x1] }
 0x3ae   :  { %v793_v15 = vld [vmem:[#allocation10 + $0x5b0] sm:$0xff]  ;;  %v1464_v36 = vmul.f32 %v1400_v11, %v2667_v59  ;;  %v728_v53 = vadd.f32 %v664_v45, %v463_v33  ;;  %v1561_v12 = vcombine.high %v1559_v63, %v1559_v63  ;;  %v1872_v11 = vld [vmem:[#allocation14 + $0x20] sm:$0xff] }
 0x3af   :  { %v801_v39 = vld [vmem:[#allocation10 + $0x5f0] sm:$0xff]  ;;  %v2115_v41 = vpack.c.bf16 %v1533_v6, %v1525_v22  ;;  %v857_v44 = vmul.f32 %v793_v15, %v2622_v3  ;;  %v1520_v57 = vadd.f32 %v1456_v25, %v1319_v47  ;;  %v1873_v15 = vld [vmem:[#allocation14 + $0x28] sm:$0xff] }
 0x3b0   :  { %v994_v20 = vld [vmem:[#allocation10 + $0x7b0] sm:$0xff]  ;;  %v865_v48 = vmul.f32 %v801_v39, %v2622_v3  ;;  %v1528_v51 = vadd.f32 %v1464_v36, %v1327_v49  ;;  %1721 = vmatprep.mubr.f32.mxu1 %v1561_v12  ;;  %v2126_v32 = vpack.c.bf16 %v1873_v15, %v1872_v11  ;;  %v730_v39 = vld [vmem:[#allocation11 + $0x1] sm:$0x1]  ;;  %v1132_v25 = vld [vmem:[#allocation11 + $0x3] sm:$0x1] }
 0x3b1   :  { %v1002_v46 = vld [vmem:[#allocation10 + $0x7f0] sm:$0xff]  ;;  %2116 = vmatprep.subr.bf16.mxu0 %v2115_v41  ;;  %v921_v54 = vadd.f32 %v857_v44, %v720_v40  ;;  %v1058_v55 = vmul.f32 %v994_v20, %v2639_v30  ;;  %v529_v41 = vld [vmem:[#allocation11] sm:$0x1]  ;;  %v932_v20 = vmul.f32 %v931_v42, %v2622_v3  ;;  %v1133_v40 = vmul.f32 %v1132_v25, %v2639_v30  ;;  %v1333_v44 = vld [vmem:[#allocation11 + $0x4] sm:$0x1] }
 0x3b2   :  { %v1195_v37 = vld [vmem:[#allocation10 + $0x9b0] sm:$0xff]  ;;  %v929_v43 = vadd.f32 %v865_v48, %v728_v53  ;;  %v1066_v61 = vmul.f32 %v1002_v46, %v2639_v30  ;;  %v2085_v7 = vpack.c.bf16 %v1528_v51, %v1520_v57  ;;  %v530_v35 = vmul.f32 %v529_v41, %v2624_v4  ;;  %v1981_v51 = vld [vmem:[#allocation16] ss:$0 sm:$0xff] }
 0x3b3   :  { %v1203_v56 = vld [vmem:[#allocation10 + $0x9f0] sm:$0xff]  ;;  %v1122_v28 = vadd.f32 %v1058_v55, %v921_v54  ;;  %v1259_v58 = vmul.f32 %v1195_v37, %v2669_v60  ;;  %v1334_v47 = vmul.f32 %v1333_v44, %v2669_v60 }
 0x3b4   :  { %v1396_v27 = vld [vmem:[#allocation10 + $0xbb0] sm:$0xff]  ;;  %v1130_v8 = vadd.f32 %v1066_v61, %v929_v43  ;;  %v1267_v9 = vmul.f32 %v1203_v56, %v2669_v60  ;;  %2086 = vmatpush1.bf16.xpose.msra.mxu1 %v2085_v7 }
 0x3b5   :  { %v1404_v62 = vld [vmem:[#allocation10 + $0xbf0] sm:$0xff]  ;;  %v1323_v10 = vadd.f32 %v1259_v58, %v1122_v28  ;;  %v1460_v29 = vmul.f32 %v1396_v27, %v2667_v59  ;;  %2119 = vmatprep.subr.bf16.mxu1 %v2406_v0 }
 0x3b6   :  { %v2158_v2 = vld [vmem:[#allocation13 + $0x8] sm:$0xff]  ;;  %v1331_v14 = vadd.f32 %v1267_v9, %v1130_v8  ;;  %v1468_v16 = vmul.f32 %v1404_v62, %v2667_v59 }
 0x3b7   :  { %v1562_v5 = vcombine.high %v2158_v2, %v2158_v2  ;;  %v1524_v17 = vadd.f32 %v1460_v29, %v1323_v10  ;;  %v1871_v24 = vld [vmem:[#allocation14 + $0x18] sm:$0xff] }
 0x3b8   :  { %v1532_v22 = vadd.f32 %v1468_v16, %v1331_v14  ;;  %v1875_v33 = vld [vmem:[#allocation14 + $0x38] sm:$0xff] }
 0x3b9   :  { %v1576_v34 = vrot.slane %v1562_v5, %v2616_v52  ;;  %v2123_v52 = vpack.c.bf16 %v1871_v24, %v1870_v23  ;;  %v2129_v38 = vpack.c.bf16 %v1875_v33, %v1874_v26 }
 0x3ba   :  { %v2117_v6 = vpack.c.bf16 %v1532_v22, %v1524_v17 }
 0x3bb   :  { %v1578_v18 = vcombine.high %v1576_v34, %v1576_v34  ;;  %1722 = vmatmul.mubr.f32.vlgmr.msra.gmra.mrb[0].mxu1 %v1559_v63 }
 0x3bc   :  { %2118 = vmatpush1.bf16.xpose.msra.mxu0 %v2117_v6  ;;  %2121 = vmatpush3.bf16.msra.mxu1 %v2120_v13 }
 0x3bd   :  { %1861 = vmatprep.mubr.f32.mxu0 %v1578_v18  ;;  %2040 = vmatprep.mubr.msk.f32.mxu1 %vm2407_vm0, %v2408_v1  ;;  %v731_v1 = vmul.f32 %v730_v39, %v2641_v31  ;;  %v1541_v31 = vsub.s32 0, %v2602_v21 }
 0x3be   :  { %2122 = vmatprep.subr.bf16.mxu1 %v2406_v0 }
 0x3bf   :  { %v732_v45 = vadd.f32 %v731_v1, %v530_v35 }
 0x3c0   :  { %2124 = vmatpush3.bf16.msra.mxu1 %v2123_v52 }
 0x3c1   :  { %2125 = vmatprep.subr.bf16.mxu1 %v2406_v0  ;;  %v933_v36 = vadd.f32 %v932_v20, %v732_v45 }
 0x3c3   :  { %1862 = vmatmul.mubr.f32.vlgmr.msra.gmra.mrb[4].mxu0 %v1576_v34  ;;  %v1134_v46 = vadd.f32 %v1133_v40, %v933_v36 }
 0x3c4   :  { %2127 = vmatpush3.bf16.msra.mxu1 %v2126_v32 }
 0x3c5   :  { %2128 = vmatprep.subr.bf16.mxu1 %v2406_v0  ;;  %v1534_v0 = vld [vmem:[#allocation11 + $0x5] sm:$0x1]  ;;  %v1335_v49 = vadd.f32 %v1334_v47, %v1134_v46 }
 0x3c6   :  { %v1535_v53 = vmul.f32 %v1534_v0, %v2667_v59 }
 0x3c8   :  { %2130 = vmatpush3.bf16.msra.mxu1 %v2129_v38  ;;  %v1536_v48 = vadd.f32 %v1535_v53, %v1335_v49 }
 0x3ca   :  { %v1542_v37 = vrot.slane %v1536_v48, %v1541_v31 }
 0x48e   :  { %v1723_v4 = vpop.f32.mrb[0].mxu1 }
 0x48f   :  { %v1725_v54 = vpop.f32.mrb[1].mxu1  ;;  %v2131_v55 = vadd.f32 %v1723_v4, %v1542_v37 }
 0x496   :  { %v1863_v3 = vpop.f32.mrb[4].mxu0 }
 0x497   :  { %v2132_v56 = vadd.f32 %v2131_v55, %v1863_v3  ;;  %v1865_v57 = vpop.f32.mrb[5].mxu0 }
 0x499   :  { %v1867_v30 = vmax.f32 %v2132_v56, 0.0 }
 0x49b   :  { %2041 = vmatmul.mubr.msk.f32.vlgmr.msra.gmra.mrb[2].mxu1 %vm1883_vm11, %v1867_v30 }
 0x56e   :  { %v1953_v60 = vpop.f32.mrb[2].mxu1 }
 0x56f   :  { %v1954_v43 = vadd.f32 %v1981_v51, %v1953_v60  ;;  %v2042_v61 = vpop.f32.mrb[3].mxu1 }
 0x571   :  { %1957 = vst [vmem:[#allocation17] sm:$0x3] %v1954_v43 }
 0x572   :  { %2370 = shalt.err (!%p2367_p6)
}
 0x573   :  { %s2371_s6 = scalar_lea.hbm %s3075_s10, 32 }
 0x574   :  { %p2372_p7 = scmp.ne.s32.totalorder %s3075_s10, %s2371_s6  ;;  %p2375_p8 = scmp.lt.u32.totalorder %s2371_s6, %s3075_s10 }
 0x576   :  { %p2377_p9 = pnand %p2375_p8, %p2372_p7 }
 0x578   :  { %2380 = shalt.err (!%p2377_p9)
}
 0x579   :  { %1967 = dma.vmem_to_hbm [thread:$0]  %s1965_s19, 32, %s3075_s10, [#allocation4]  }
 0x57a   :  { %2391 = dma.done.wait [#allocation4], 32  }
 0x57b   :  { %2392 = vsyncadd [#allocation4], 4294967264 }
 0x57c   :  { %1971 = vsyncpa [#allocation3], 1 }
 0x57d   :  { %1972 = vsyncpa [#allocation6], 1 }
 0x57e   :  { %1973 = vsyncpa [#allocation9], 1 }
 0x57f   :  { %1974 = vsyncpa [#allocation12], 1 }
 0x580   :  { %1975 = vsyncpa [#allocation15], 1 }
 0x581   :  { %1976 = vsyncpa [#allocation4], 1 }

</bundles_post_ra>
